<compile_context>
chip_gen: v7x
topology: tpu7x:2x2x1
jax: 0.10.0
libtpu: 0.0.40
codegen_flags: <defaults>
</compile_context>

<pallas_src>
import functools
import numpy as np
import jax
import jax.numpy as jnp
from jax.experimental import pallas as pl
from jax.experimental.pallas import tpu as pltpu

IMAGENET_MEAN = np.array([0.485, 0.456, 0.406], np.float32)
IMAGENET_STD = np.array([0.229, 0.224, 0.225], np.float32)

# Explicit scoped-VMEM cap: 32 MiB is safe on v5e/v6e (128 MiB) and v7x (64 MiB).
# With the real WRN50 width (D~1536) the double-buffered bf16 bank tile at
# tm=2048 is ~12.6 MiB, still well inside this cap.
_VMEM_LIMIT = 32 * 1024 * 1024
_BANK_TILE = 2048        # memory-bank rows per j-step (clamped to the bank size)


def _round_up(x, m):
    return (x + m - 1) // m * m


# ------------------------- memory-bank setup (one-time) ----------------------


def prepare_memory_bank(memory_bank):
    """One-time setup (run OUTSIDE the jitted forward; the bank is static).

    Returns (bank_f32, bank_bf16_padded, bank_sq_padded):
      * bank_bf16 is padded to a multiple of the bank tile so the streaming
        kernels never need remainder handling,
      * padded rows get a huge squared norm so they can never win the argmin /
        top_k.
    """
    bank_f32 = jnp.asarray(memory_bank, jnp.float32)
    M, _ = bank_f32.shape
    tm = min(_BANK_TILE, _round_up(M, 128))
    Mp = _round_up(M, tm)
    sq = jnp.sum(bank_f32 * bank_f32, axis=-1)
    bank_bf16 = jnp.pad(bank_f32, ((0, Mp - M), (0, 0))).astype(jnp.bfloat16)
    bank_sq = jnp.pad(sq, (0, Mp - M), constant_values=1e30)[None, :]
    return bank_f32, bank_bf16, bank_sq


# ----------------------------- Pallas kernels -------------------------------


def _conv_pool_kernel(xp_ref, w_ref, b_ref, cnt_ref, o_ref):
    """Fused 1x1 conv (Cin=3 -> VPU FMAs) + AvgPool2d(3,1,1) (separable sums).

    xp_ref : (1, H+2, W+2, Cin)  zero-padded, *unnormalized* block-mean input
    w_ref  : (Cin, Cout)         conv weight with ImageNet normalize folded in
    b_ref  : (1, Cout)           conv bias with ImageNet normalize folded in
    cnt_ref: (1, H, W, 1)        n_valid_taps / 9 (bias correction for zero pad)
    o_ref  : (1, H, W, Cout)
    """
    H, W = o_ref.shape[1], o_ref.shape[2]
    xp = xp_ref[...]                                   # (1, Hp, Wp, Cin) f32
    Cin = xp.shape[-1]
    # 1x1 conv as Cin broadcast FMAs on the VPU (avoids a K=3 MXU relayout).
    # Pad ring stays exactly 0, which is what AvgPool's zero padding requires.
    yp = xp[..., 0:1] * w_ref[0]
    for c in range(1, Cin):
        yp = yp + xp[..., c:c + 1] * w_ref[c]
    # separable 3x3 box sum: 3 row adds + 3 col adds (instead of 9 shifted adds)
    v = yp[:, 0:H, :, :] + yp[:, 1:H + 1, :, :] + yp[:, 2:H + 2, :, :]
    s = v[:, :, 0:W, :] + v[:, :, 1:W + 1, :] + v[:, :, 2:W + 2, :]
    # bias contributes only through taps that land inside the valid HxW area
    o_ref[...] = s * (1.0 / 9.0) + cnt_ref[...] * b_ref[...]


def conv1x1_avgpool3(x_nhwc, w, b):
    """AvgPool2d(3,1,1)( x @ w + b ) fused in one Pallas kernel (one HBM pass)."""
    B, H, W, Cin = x_nhwc.shape
    Cout = w.shape[1]
    xp = jnp.pad(x_nhwc.astype(jnp.float32), ((0, 0), (1, 1), (1, 1), (0, 0)))
    rv = np.full((H,), 3.0, np.float32); rv[0] -= 1.0; rv[-1] -= 1.0
    cv = np.full((W,), 3.0, np.float32); cv[0] -= 1.0; cv[-1] -= 1.0
    cnt = (rv[:, None] * cv[None, :] / 9.0).reshape(1, H, W, 1)
    return pl.pallas_call(
        _conv_pool_kernel,
        out_shape=jax.ShapeDtypeStruct((B, H, W, Cout), jnp.float32),
        grid=(B,),
        in_specs=[pl.BlockSpec((1, H + 2, W + 2, Cin), lambda bb: (bb, 0, 0, 0)),
                  pl.BlockSpec((Cin, Cout), lambda bb: (0, 0)),
                  pl.BlockSpec((1, Cout), lambda bb: (0, 0)),
                  pl.BlockSpec((1, H, W, 1), lambda bb: (0, 0, 0, 0))],
        out_specs=pl.BlockSpec((1, H, W, Cout), lambda bb: (bb, 0, 0, 0)),
        compiler_params=pltpu.CompilerParams(
            dimension_semantics=("parallel",),
            vmem_limit_bytes=_VMEM_LIMIT),
    )(xp, w.astype(jnp.float32), b.reshape(1, Cout).astype(jnp.float32),
      jnp.asarray(cnt))


def _nn_kernel(tm, x_ref, y_ref, xn_ref, yn_ref, dmin_ref, loc_ref):
    """Fused euclidean_dist(x, memory_bank) + min/argmin over the bank.

    Streams the memory bank in bf16 over the j (arbitrary) grid axis, keeps the
    running minimum as a SQUARED distance and takes a single sqrt at the end.
    Norms are precomputed f32 inputs (xn: (tn,1), yn: (1,tm)).
    """
    j = pl.program_id(1)

    @pl.when(j == 0)
    def _():
        dmin_ref[...] = jnp.full_like(dmin_ref, jnp.inf)
        loc_ref[...] = jnp.zeros_like(loc_ref)

    xy = jax.lax.dot_general(x_ref[...], y_ref[...], (((1,), (1,)), ((), ())),
                             preferred_element_type=jnp.float32)   # (tn, tm) f32
    d2 = jnp.maximum(xn_ref[...] - 2.0 * xy + yn_ref[...], 0.0)    # squared dist
    tile_min = jnp.min(d2, axis=1, keepdims=True)                  # (tn, 1)
    # first-occurrence argmin within the tile; sentinel assumes M < 2**30
    col = jax.lax.broadcasted_iota(jnp.int32, d2.shape, 1) + j * tm
    tile_arg = jnp.min(jnp.where(d2 <= tile_min, col, jnp.int32(2 ** 30)),
                       axis=1, keepdims=True)
    better = tile_min < dmin_ref[...]
    loc_ref[...] = jnp.where(better, tile_arg, loc_ref[...])
    dmin_ref[...] = jnp.where(better, tile_min, dmin_ref[...])

    @pl.when(j == pl.num_programs(1) - 1)
    def _():
        dmin_ref[...] = jnp.sqrt(dmin_ref[...])


def _choose_tn(n):
    """Query-axis tile: >=2 i-blocks (v7x megacore), 256-multiples when possible."""
    if n >= 512:
        return 256
    if n >= 256:
        return 128
    return min(128, max(8, _round_up(-(-n // 2), 8)))


def nearest_neighbors_pallas(embedding, bank_bf16, bank_sq_norms):
    """nearest_neighbors(n_neighbors=1): returns (min distance, argmin index).

    The bank arrives pre-padded / pre-cast (prepare_memory_bank); padded bank
    rows carry a huge squared norm so they never win.
    """
    N, D = embedding.shape
    Mp = bank_bf16.shape[0]
    tn = _choose_tn(N)
    Np = _round_up(N, tn)
    tm = min(_BANK_TILE, Mp)
    assert Mp % tm == 0

    emb_sq = jnp.sum(embedding * embedding, axis=-1, keepdims=True)   # (N,1) f32
    x = embedding
    if Np > N:                                       # pad queries (rows dropped)
        x = jnp.pad(x, ((0, Np - N), (0, 0)))
        emb_sq = jnp.pad(emb_sq, ((0, Np - N), (0, 0)))
    x_bf = x.astype(jnp.bfloat16)                    # bf16 halves the DMA bytes
    # NOTE(v7x): if DMA is still exposed after enlarging tm, add
    # pipeline_mode=pl.Buffered(3) on the memory-bank BlockSpec (check VMEM).
    dmin, loc = pl.pallas_call(
        functools.partial(_nn_kernel, tm),
        out_shape=(jax.ShapeDtypeStruct((Np, 1), jnp.float32),
                   jax.ShapeDtypeStruct((Np, 1), jnp.int32)),
        grid=(Np // tn, Mp // tm),
        in_specs=[pl.BlockSpec((tn, D), lambda i, j: (i, 0)),
                  pl.BlockSpec((tm, D), lambda i, j: (j, 0)),
                  pl.BlockSpec((tn, 1), lambda i, j: (i, 0)),
                  pl.BlockSpec((1, tm), lambda i, j: (0, j))],
        out_specs=(pl.BlockSpec((tn, 1), lambda i, j: (i, 0)),
                   pl.BlockSpec((tn, 1), lambda i, j: (i, 0))),
        compiler_params=pltpu.CompilerParams(
            dimension_semantics=("parallel", "arbitrary"),
            vmem_limit_bytes=_VMEM_LIMIT),
    )(x_bf, bank_bf16, emb_sq, bank_sq_norms)
    return dmin[:N, 0], loc[:N, 0]


def _sqdist_kernel(x_ref, xn_ref, y_ref, yn_ref, o_ref):
    xy = jax.lax.dot_general(x_ref[...], y_ref[...], (((1,), (1,)), ((), ())),
                             preferred_element_type=jnp.float32)
    o_ref[...] = jnp.maximum(xn_ref[...] - 2.0 * xy + yn_ref[...], 0.0)


def sq_dist_to_bank_pallas(x, bank_bf16, bank_sq_norms):
    """Squared pair-wise distances x vs (bf16-streamed) memory bank, bank-tiled.

    Squared is sufficient: the caller only ranks the results with top_k.
    """
    N, D = x.shape
    Mp = bank_bf16.shape[0]
    tm = min(_BANK_TILE, Mp)
    assert Mp % tm == 0
    xn = jnp.sum(x.astype(jnp.float32) ** 2, axis=-1, keepdims=True)   # (N,1)
    return pl.pallas_call(
        _sqdist_kernel,
        out_shape=jax.ShapeDtypeStruct((N, Mp), jnp.float32),
        grid=(Mp // tm,),
        in_specs=[pl.BlockSpec((N, D), lambda j: (0, 0)),
                  pl.BlockSpec((N, 1), lambda j: (0, 0)),
                  pl.BlockSpec((tm, D), lambda j: (j, 0)),
                  pl.BlockSpec((1, tm), lambda j: (0, j))],
        out_specs=pl.BlockSpec((N, tm), lambda j: (0, j)),
        compiler_params=pltpu.CompilerParams(
            dimension_semantics=("parallel",),
            vmem_limit_bytes=_VMEM_LIMIT),
    )(x.astype(jnp.bfloat16), xn, bank_bf16, bank_sq_norms)


def _amap_kernel(s_ref, av_ref, aw_ref, o_ref):
    # fused nearest-upsample + reflect-pad Gaussian blur + bilinear-to-img_size
    # as two small banded matmuls: o = A_row @ s @ A_col   (bf16 in, f32 acc)
    t = jax.lax.dot_general(av_ref[...], s_ref[0], (((1,), (0,)), ((), ())),
                            preferred_element_type=jnp.float32)      # (img, w)
    o_ref[0] = jax.lax.dot_general(t.astype(jnp.bfloat16), aw_ref[...],
                                   (((1,), (0,)), ((), ())),
                                   preferred_element_type=jnp.float32)


def _build_amap_matrices(h, w, up_size, out_size, sigma=4.0):
    """Host precompute of the per-axis linear operator:
    bilinear(out_size) o gaussian_blur(sigma, reflect) o nearest_upsample(up_size)."""
    ksize = 2 * int(4.0 * sigma + 0.5) + 1       # == 33 for sigma=4 (anomalib)
    half = ksize // 2
    xs = np.arange(ksize, dtype=np.float64) - half
    g = np.exp(-(xs ** 2) / (2.0 * sigma ** 2)); g = g / g.sum()

    def nearest_mat(n_out, n_in):                # torch F.interpolate 'nearest'
        m = np.zeros((n_out, n_in), np.float64)
        src = np.minimum((np.arange(n_out) * n_in) // n_out, n_in - 1)
        m[np.arange(n_out), src] = 1.0
        return m

    def reflect(idx, n):                         # numpy/kornia 'reflect' (no edge repeat)
        if n == 1:
            return 0
        period = 2 * (n - 1)
        idx = idx % period
        return idx if idx < n else period - idx

    def blur_mat(n):
        m = np.zeros((n, n), np.float64)
        for r in range(n):
            for k in range(ksize):
                m[r, reflect(r - half + k, n)] += g[k]
        return m

    def bilinear_mat(n_out, n_in):               # align_corners=False, no antialias
        m = np.zeros((n_out, n_in), np.float64)
        if n_out == n_in:
            np.fill_diagonal(m, 1.0)
            return m
        scale = n_in / n_out
        for i in range(n_out):
            src = (i + 0.5) * scale - 0.5
            i0 = int(np.floor(src))
            frac = src - i0
            m[i, min(max(i0, 0), n_in - 1)] += 1.0 - frac
            m[i, min(max(i0 + 1, 0), n_in - 1)] += frac
        return m

    blur = blur_mat(up_size)
    a_row = bilinear_mat(out_size, up_size) @ blur @ nearest_mat(up_size, h)
    a_col = (bilinear_mat(out_size, up_size) @ blur @ nearest_mat(up_size, w)).T
    return a_row.astype(np.float32), a_col.astype(np.float32)


def anomaly_map_pallas(patch_scores_b1hw, a_row, a_col):
    B, _, h, w = patch_scores_b1hw.shape
    out = a_row.shape[0]
    s = patch_scores_b1hw.reshape(B, h, w).astype(jnp.bfloat16)
    res = pl.pallas_call(
        _amap_kernel,
        out_shape=jax.ShapeDtypeStruct((B, out, out), jnp.float32),
        grid=(B,),
        in_specs=[pl.BlockSpec((1, h, w), lambda b: (b, 0, 0)),
                  pl.BlockSpec((out, h), lambda b: (0, 0)),
                  pl.BlockSpec((w, out), lambda b: (0, 0))],
        out_specs=pl.BlockSpec((1, out, out), lambda b: (b, 0, 0)),
        compiler_params=pltpu.CompilerParams(
            dimension_semantics=("parallel",),
            vmem_limit_bytes=_VMEM_LIMIT),
    )(s, jnp.asarray(a_row, jnp.bfloat16), jnp.asarray(a_col, jnp.bfloat16))
    return res.reshape(B, 1, out, out)


# ------------------------------ model (glue) --------------------------------


def _block_mean(x_nhwc, k):
    B, H, W, C = x_nhwc.shape
    return x_nhwc.reshape(B, H // k, k, W // k, k, C).mean(axis=(2, 4))


def synthetic_backbone(x_nhwc, eff_params):
    # TODO(synk): stand-in for pretrained wide_resnet50_2 layer2/layer3 feature
    # maps (stride 8 / stride 16); deterministic 1x1-conv projections with the
    # ImageNet normalize folded into the weights, AvgPool2d(3,1,1) fused in.
    # layer2 / layer3 write disjoint channel ranges of one lane-dense D-wide
    # buffer, so generate_embedding's concat becomes a plain add downstream.
    f2 = conv1x1_avgpool3(_block_mean(x_nhwc, 8),
                          eff_params["w2p"], eff_params["b2p"])
    f3 = conv1x1_avgpool3(_block_mean(x_nhwc, 16),
                          eff_params["w3p"], eff_params["b3p"])
    return f2, f3


def compute_anomaly_score(patch_scores, locations, embedding,
                          bank_f32, bank_bf16, bank_sq, num_neighbors):
    B, P = patch_scores.shape
    M = bank_f32.shape[0]
    max_patches = jnp.argmax(patch_scores, axis=1)
    emb = embedding.reshape(B, P, -1)
    max_feats = emb[jnp.arange(B), max_patches]            # (B, D)
    score = patch_scores[jnp.arange(B), max_patches]       # (B,)
    nn_index = locations[jnp.arange(B), max_patches]       # (B,)
    nn_sample = bank_f32[nn_index]                         # (B, D)
    k = min(num_neighbors, M)
    # squared distances suffice: only their ranking feeds top_k
    sq = sq_dist_to_bank_pallas(nn_sample, bank_bf16, bank_sq)[:, :M]   # (B, M)
    _, support = jax.lax.top_k(-sq, k)                     # k smallest distances
    mb_sup = bank_f32[support]                             # (B, k, D)
    xn = jnp.sum(max_feats ** 2, axis=-1)[:, None]         # (B, 1)
    yn = jnp.sum(mb_sup ** 2, axis=-1)                     # (B, k)
    xy = jnp.einsum("bd,bkd->bk", max_feats, mb_sup)       # (B, k)
    d = jnp.sqrt(jnp.maximum(xn - 2.0 * xy + yn, 0.0))     # real distances (B, k)
    weights = 1.0 - jax.nn.softmax(d, axis=1)[:, 0]
    return weights * score


def patchcore_forward(x_nhwc, eff_params, bank_f32, bank_bf16, bank_sq,
                      input_size, img_size, num_neighbors=9):
    B = x_nhwc.shape[0]
    f2, f3 = synthetic_backbone(x_nhwc, eff_params)        # pool already fused
    # generate_embedding: bilinear-upsample layer3 to layer2 spatial; since the
    # two projections occupy disjoint channel ranges, concat == add (lane-dense)
    f3u = jax.image.resize(f3, (B, f2.shape[1], f2.shape[2], f3.shape[3]),
                           method="bilinear")
    emb = f2 + f3u                                         # NHWC (B, h, w, D)
    h, w = emb.shape[1], emb.shape[2]
    embedding = emb.reshape(-1, emb.shape[-1])             # reshape_embedding
    # nearest_neighbors(n_neighbors=1): fused sq-dist + min/argmin Pallas kernel
    patch_scores, locations = nearest_neighbors_pallas(embedding, bank_bf16,
                                                       bank_sq)
    patch_scores = patch_scores.reshape(B, -1)
    locations = locations.reshape(B, -1)
    pred_score = compute_anomaly_score(patch_scores, locations, embedding,
                                       bank_f32, bank_bf16, bank_sq,
                                       num_neighbors)
    patch_scores = patch_scores.reshape(B, 1, h, w)
    # AnomalyMapGenerator (nearest upsample -> Gaussian blur sigma=4) + the
    # classifier's final bilinear resize, all fused into one banded-matmul kernel.
    a_row, a_col = _build_amap_matrices(h, w, input_size, img_size, sigma=4.0)
    anomaly_map = anomaly_map_pallas(patch_scores, a_row, a_col)
    return anomaly_map, pred_score


def classifier_patchcore_forward(hr_nchw, params, bank_f32, bank_bf16, bank_sq,
                                 threshold, input_size=64):
    B, C, Hin, Win = hr_nchw.shape
    img_size = Win
    hr = hr_nchw.astype(jnp.float32)
    if C != 3:
        hr = jnp.tile(hr, (1, 3, 1, 1))                    # hr.repeat(1, 3, 1, 1)
    # mode contains 'mnist' -> divide by 2 if max > 1 (original runs batch=1, so
    # a per-sample max matches its scalar check without coupling samples)
    smax = jnp.max(hr, axis=(1, 2, 3), keepdims=True)
    hr = jnp.where(smax > 1.0, hr / 2.0, hr)
    hr = jax.image.resize(hr, (B, 3, input_size, input_size), method="bilinear")
    x_nhwc = jnp.transpose(hr, (0, 2, 3, 1))
    # Fold transforms.Normalize(mean,std) into the 1x1-conv weights/bias:
    #   ((x - m)/s) @ w + b  ==  x @ (w/s) + (b - (m/s) @ w)
    # and pack layer2 -> channels [0,C2), layer3 -> channels [C2,D) so each conv
    # writes a lane-dense D-wide output.
    mean = jnp.asarray(IMAGENET_MEAN)
    std = jnp.asarray(IMAGENET_STD)
    C2 = params["w2"].shape[1]
    C3 = params["w3"].shape[1]
    D = C2 + C3
    w2e = params["w2"] / std[:, None]
    b2e = params["b2"] - (mean / std) @ params["w2"]
    w3e = params["w3"] / std[:, None]
    b3e = params["b3"] - (mean / std) @ params["w3"]
    eff_params = {
        "w2p": jnp.zeros((3, D), jnp.float32).at[:, :C2].set(w2e),
        "b2p": jnp.zeros((D,), jnp.float32).at[:C2].set(b2e),
        "w3p": jnp.zeros((3, D), jnp.float32).at[:, C2:].set(w3e),
        "b3p": jnp.zeros((D,), jnp.float32).at[C2:].set(b3e),
    }
    anomaly_map, pred_score = patchcore_forward(x_nhwc, eff_params, bank_f32,
                                                bank_bf16, bank_sq,
                                                input_size, img_size)
    # original compares a python scalar (batch=1); generalized elementwise here
    label = jnp.where(pred_score > threshold, 1, 0)
    return label, anomaly_map, pred_score


# ---------------------------------- main -------------------------------------

if __name__ == "__main__":
    key = jax.random.PRNGKey(0)
    k_in, k_w2, k_b2, k_w3, k_b3, k_mb = jax.random.split(key, 6)

    C2, C3 = 48, 80           # stand-ins for wide_resnet50_2 layer2/layer3 widths
    D = C2 + C3               # 128 -> lane-dense embedding for the NN MXU scan
    params = {
        "w2": 0.5 * jax.random.normal(k_w2, (3, C2), jnp.float32),
        "b2": 0.1 * jax.random.normal(k_b2, (C2,), jnp.float32),
        "w3": 0.5 * jax.random.normal(k_w3, (3, C3), jnp.float32),
        "b3": 0.1 * jax.random.normal(k_b3, (C3,), jnp.float32),
    }
    # TODO(synk): memory_bank is loaded from .npy in the original; synthetic here.
    memory_bank = jax.random.normal(k_mb, (256, D), jnp.float32)
    # One-time bank setup hoisted out of the per-inference path (bank is static).
    bank_f32, bank_bf16, bank_sq = prepare_memory_bank(memory_bank)
    # TODO(synk): calc_threshold() needs a test DataLoader; fixed threshold instead.
    threshold = jnp.float32(1.0)

    hr = jax.random.uniform(k_in, (2, 1, 48, 48), jnp.float32)

    fwd = jax.jit(functools.partial(classifier_patchcore_forward, input_size=64))
    label, anomaly_map, pred_score = fwd(hr, params, bank_f32, bank_bf16,
                                         bank_sq, threshold)
    jax.block_until_ready((label, anomaly_map, pred_score))

    assert anomaly_map.shape == (2, 1, 48, 48)
    assert pred_score.shape == (2,)
    assert label.shape == (2,)
    print("KERNEL_OK")
</pallas_src>

<mosaic_0001>
module attributes {stable_mosaic.version = 11 : i64} {
  func.func @_conv_pool_kernel(%arg0: i32, %arg1: memref<1x10x10x3xf32, #tpu.memory_space<vmem>>, %arg2: memref<3x128xf32, #tpu.memory_space<vmem>>, %arg3: memref<1x128xf32, #tpu.memory_space<vmem>>, %arg4: memref<1x8x8x1xf32, #tpu.memory_space<vmem>>, %arg5: memref<1x8x8x128xf32, #tpu.memory_space<vmem>>) attributes {dimension_semantics = [#tpu.dimension_semantics<parallel>], iteration_bounds = array<i64: 2>, scalar_prefetch = 0 : i64, scratch_operands = 0 : i64, tpu.core_type = #tpu.core_type<tc>, window_params = [{transform_indices = @transform_0, window_bounds = array<i64: 1, 10, 10, 3>}, {pipeline_mode = #tpu.pipeline_mode<synchronous>, transform_indices = @transform_1, window_bounds = array<i64: 3, 128>}, {pipeline_mode = #tpu.pipeline_mode<synchronous>, transform_indices = @transform_2, window_bounds = array<i64: 1, 128>}, {pipeline_mode = #tpu.pipeline_mode<synchronous>, transform_indices = @transform_3, window_bounds = array<i64: 1, 8, 8, 1>}, {transform_indices = @transform_4, window_bounds = array<i64: 1, 8, 8, 128>}]} {
    %c0 = arith.constant 0 : index
    %c0_0 = arith.constant 0 : index
    %c0_1 = arith.constant 0 : index
    %c0_2 = arith.constant 0 : index
    %0 = vector.load %arg1[%c0, %c0_0, %c0_1, %c0_2] : memref<1x10x10x3xf32, #tpu.memory_space<vmem>>, vector<1x10x10x3xf32>
    %1 = vector.extract_strided_slice %0 {offsets = [0, 0, 0, 0], sizes = [1, 10, 10, 1], strides = [1, 1, 1, 1]} : vector<1x10x10x3xf32> to vector<1x10x10x1xf32>
    %c0_3 = arith.constant 0 : index
    %c0_4 = arith.constant 0 : index
    %2 = vector.load %arg2[%c0_3, %c0_4] : memref<3x128xf32, #tpu.memory_space<vmem>>, vector<1x128xf32>
    %3 = vector.shape_cast %2 : vector<1x128xf32> to vector<128xf32>
    %4 = vector.shape_cast %3 : vector<128xf32> to vector<1x1x1x128xf32>
    %5 = vector.broadcast %1 : vector<1x10x10x1xf32> to vector<1x10x10x128xf32>
    %6 = vector.broadcast %4 : vector<1x1x1x128xf32> to vector<1x10x10x128xf32>
    %7 = arith.mulf %5, %6 : vector<1x10x10x128xf32>
    %8 = vector.extract_strided_slice %0 {offsets = [0, 0, 0, 1], sizes = [1, 10, 10, 1], strides = [1, 1, 1, 1]} : vector<1x10x10x3xf32> to vector<1x10x10x1xf32>
    %c1 = arith.constant 1 : index
    %c0_5 = arith.constant 0 : index
    %9 = vector.load %arg2[%c1, %c0_5] : memref<3x128xf32, #tpu.memory_space<vmem>>, vector<1x128xf32>
    %10 = vector.shape_cast %9 : vector<1x128xf32> to vector<128xf32>
    %11 = vector.shape_cast %10 : vector<128xf32> to vector<1x1x1x128xf32>
    %12 = vector.broadcast %8 : vector<1x10x10x1xf32> to vector<1x10x10x128xf32>
    %13 = vector.broadcast %11 : vector<1x1x1x128xf32> to vector<1x10x10x128xf32>
    %14 = arith.mulf %12, %13 : vector<1x10x10x128xf32>
    %15 = arith.addf %7, %14 : vector<1x10x10x128xf32>
    %16 = vector.extract_strided_slice %0 {offsets = [0, 0, 0, 2], sizes = [1, 10, 10, 1], strides = [1, 1, 1, 1]} : vector<1x10x10x3xf32> to vector<1x10x10x1xf32>
    %c2 = arith.constant 2 : index
    %c0_6 = arith.constant 0 : index
    %17 = vector.load %arg2[%c2, %c0_6] : memref<3x128xf32, #tpu.memory_space<vmem>>, vector<1x128xf32>
    %18 = vector.shape_cast %17 : vector<1x128xf32> to vector<128xf32>
    %19 = vector.shape_cast %18 : vector<128xf32> to vector<1x1x1x128xf32>
    %20 = vector.broadcast %16 : vector<1x10x10x1xf32> to vector<1x10x10x128xf32>
    %21 = vector.broadcast %19 : vector<1x1x1x128xf32> to vector<1x10x10x128xf32>
    %22 = arith.mulf %20, %21 : vector<1x10x10x128xf32>
    %23 = arith.addf %15, %22 : vector<1x10x10x128xf32>
    %24 = vector.extract_strided_slice %23 {offsets = [0, 0, 0, 0], sizes = [1, 8, 10, 128], strides = [1, 1, 1, 1]} : vector<1x10x10x128xf32> to vector<1x8x10x128xf32>
    %25 = vector.extract_strided_slice %23 {offsets = [0, 1, 0, 0], sizes = [1, 8, 10, 128], strides = [1, 1, 1, 1]} : vector<1x10x10x128xf32> to vector<1x8x10x128xf32>
    %26 = arith.addf %24, %25 : vector<1x8x10x128xf32>
    %27 = vector.extract_strided_slice %23 {offsets = [0, 2, 0, 0], sizes = [1, 8, 10, 128], strides = [1, 1, 1, 1]} : vector<1x10x10x128xf32> to vector<1x8x10x128xf32>
    %28 = arith.addf %26, %27 : vector<1x8x10x128xf32>
    %29 = vector.extract_strided_slice %28 {offsets = [0, 0, 0, 0], sizes = [1, 8, 8, 128], strides = [1, 1, 1, 1]} : vector<1x8x10x128xf32> to vector<1x8x8x128xf32>
    %30 = vector.extract_strided_slice %28 {offsets = [0, 0, 1, 0], sizes = [1, 8, 8, 128], strides = [1, 1, 1, 1]} : vector<1x8x10x128xf32> to vector<1x8x8x128xf32>
    %31 = arith.addf %29, %30 : vector<1x8x8x128xf32>
    %32 = vector.extract_strided_slice %28 {offsets = [0, 0, 2, 0], sizes = [1, 8, 8, 128], strides = [1, 1, 1, 1]} : vector<1x8x10x128xf32> to vector<1x8x8x128xf32>
    %33 = arith.addf %31, %32 : vector<1x8x8x128xf32>
    %cst = arith.constant 0.111111112 : f32
    %34 = vector.broadcast %cst : f32 to vector<1x8x8x128xf32>
    %35 = arith.mulf %33, %34 : vector<1x8x8x128xf32>
    %c0_7 = arith.constant 0 : index
    %c0_8 = arith.constant 0 : index
    %c0_9 = arith.constant 0 : index
    %c0_10 = arith.constant 0 : index
    %36 = vector.load %arg4[%c0_7, %c0_8, %c0_9, %c0_10] : memref<1x8x8x1xf32, #tpu.memory_space<vmem>>, vector<1x8x8x1xf32>
    %c0_11 = arith.constant 0 : index
    %c0_12 = arith.constant 0 : index
    %37 = vector.load %arg3[%c0_11, %c0_12] : memref<1x128xf32, #tpu.memory_space<vmem>>, vector<1x128xf32>
    %38 = vector.shape_cast %37 : vector<1x128xf32> to vector<1x1x1x128xf32>
    %39 = vector.broadcast %36 : vector<1x8x8x1xf32> to vector<1x8x8x128xf32>
    %40 = vector.broadcast %38 : vector<1x1x1x128xf32> to vector<1x8x8x128xf32>
    %41 = arith.mulf %39, %40 : vector<1x8x8x128xf32>
    %42 = arith.addf %35, %41 : vector<1x8x8x128xf32>
    %c0_13 = arith.constant 0 : index
    %c0_14 = arith.constant 0 : index
    %c0_15 = arith.constant 0 : index
    %c0_16 = arith.constant 0 : index
    %43 = vector.load %arg5[%c0_13, %c0_14, %c0_15, %c0_16] : memref<1x8x8x128xf32, #tpu.memory_space<vmem>>, vector<1x8x8x128xf32>
    tpu.vector_store %arg5[%c0_13, %c0_14, %c0_15, %c0_16], %42 {strides = array<i32>} : memref<1x8x8x128xf32, #tpu.memory_space<vmem>>, vector<1x8x8x128xf32>,
    return
  }
  func.func @transform_0(%arg0: i32) -> (i32, i32, i32, i32) {
    %c0_i32 = arith.constant 0 : i32
    %c0_i32_0 = arith.constant 0 : i32
    %c0_i32_1 = arith.constant 0 : i32
    %c0_i32_2 = arith.constant 0 : i32
    return %arg0, %c0_i32, %c0_i32_0, %c0_i32_1 : i32, i32, i32, i32
  }
  func.func @transform_1(%arg0: i32) -> (i32, i32) {
    %c0_i32 = arith.constant 0 : i32
    %c0_i32_0 = arith.constant 0 : i32
    %c0_i32_1 = arith.constant 0 : i32
    return %c0_i32, %c0_i32_0 : i32, i32
  }
  func.func @transform_2(%arg0: i32) -> (i32, i32) {
    %c0_i32 = arith.constant 0 : i32
    %c0_i32_0 = arith.constant 0 : i32
    %c0_i32_1 = arith.constant 0 : i32
    return %c0_i32, %c0_i32_0 : i32, i32
  }
  func.func @transform_3(%arg0: i32) -> (i32, i32, i32, i32) {
    %c0_i32 = arith.constant 0 : i32
    %c0_i32_0 = arith.constant 0 : i32
    %c0_i32_1 = arith.constant 0 : i32
    %c0_i32_2 = arith.constant 0 : i32
    %c0_i32_3 = arith.constant 0 : i32
    return %c0_i32, %c0_i32_0, %c0_i32_1, %c0_i32_2 : i32, i32, i32, i32
  }
  func.func @transform_4(%arg0: i32) -> (i32, i32, i32, i32) {
    %c0_i32 = arith.constant 0 : i32
    %c0_i32_0 = arith.constant 0 : i32
    %c0_i32_1 = arith.constant 0 : i32
    %c0_i32_2 = arith.constant 0 : i32
    return %arg0, %c0_i32, %c0_i32_0, %c0_i32_1 : i32, i32, i32, i32
  }
}

module attributes {stable_mosaic.version = 11 : i64} {
  func.func @_conv_pool_kernel(%arg0: i32, %arg1: memref<1x6x6x3xf32, #tpu.memory_space<vmem>>, %arg2: memref<3x128xf32, #tpu.memory_space<vmem>>, %arg3: memref<1x128xf32, #tpu.memory_space<vmem>>, %arg4: memref<1x4x4x1xf32, #tpu.memory_space<vmem>>, %arg5: memref<1x4x4x128xf32, #tpu.memory_space<vmem>>) attributes {dimension_semantics = [#tpu.dimension_semantics<parallel>], iteration_bounds = array<i64: 2>, scalar_prefetch = 0 : i64, scratch_operands = 0 : i64, tpu.core_type = #tpu.core_type<tc>, window_params = [{transform_indices = @transform_0, window_bounds = array<i64: 1, 6, 6, 3>}, {pipeline_mode = #tpu.pipeline_mode<synchronous>, transform_indices = @transform_1, window_bounds = array<i64: 3, 128>}, {pipeline_mode = #tpu.pipeline_mode<synchronous>, transform_indices = @transform_2, window_bounds = array<i64: 1, 128>}, {pipeline_mode = #tpu.pipeline_mode<synchronous>, transform_indices = @transform_3, window_bounds = array<i64: 1, 4, 4, 1>}, {transform_indices = @transform_4, window_bounds = array<i64: 1, 4, 4, 128>}]} {
    %c0 = arith.constant 0 : index
    %c0_0 = arith.constant 0 : index
    %c0_1 = arith.constant 0 : index
    %c0_2 = arith.constant 0 : index
    %0 = vector.load %arg1[%c0, %c0_0, %c0_1, %c0_2] : memref<1x6x6x3xf32, #tpu.memory_space<vmem>>, vector<1x6x6x3xf32>
    %1 = vector.extract_strided_slice %0 {offsets = [0, 0, 0, 0], sizes = [1, 6, 6, 1], strides = [1, 1, 1, 1]} : vector<1x6x6x3xf32> to vector<1x6x6x1xf32>
    %c0_3 = arith.constant 0 : index
    %c0_4 = arith.constant 0 : index
    %2 = vector.load %arg2[%c0_3, %c0_4] : memref<3x128xf32, #tpu.memory_space<vmem>>, vector<1x128xf32>
    %3 = vector.shape_cast %2 : vector<1x128xf32> to vector<128xf32>
    %4 = vector.shape_cast %3 : vector<128xf32> to vector<1x1x1x128xf32>
    %5 = vector.broadcast %1 : vector<1x6x6x1xf32> to vector<1x6x6x128xf32>
    %6 = vector.broadcast %4 : vector<1x1x1x128xf32> to vector<1x6x6x128xf32>
    %7 = arith.mulf %5, %6 : vector<1x6x6x128xf32>
    %8 = vector.extract_strided_slice %0 {offsets = [0, 0, 0, 1], sizes = [1, 6, 6, 1], strides = [1, 1, 1, 1]} : vector<1x6x6x3xf32> to vector<1x6x6x1xf32>
    %c1 = arith.constant 1 : index
    %c0_5 = arith.constant 0 : index
    %9 = vector.load %arg2[%c1, %c0_5] : memref<3x128xf32, #tpu.memory_space<vmem>>, vector<1x128xf32>
    %10 = vector.shape_cast %9 : vector<1x128xf32> to vector<128xf32>
    %11 = vector.shape_cast %10 : vector<128xf32> to vector<1x1x1x128xf32>
    %12 = vector.broadcast %8 : vector<1x6x6x1xf32> to vector<1x6x6x128xf32>
    %13 = vector.broadcast %11 : vector<1x1x1x128xf32> to vector<1x6x6x128xf32>
    %14 = arith.mulf %12, %13 : vector<1x6x6x128xf32>
    %15 = arith.addf %7, %14 : vector<1x6x6x128xf32>
    %16 = vector.extract_strided_slice %0 {offsets = [0, 0, 0, 2], sizes = [1, 6, 6, 1], strides = [1, 1, 1, 1]} : vector<1x6x6x3xf32> to vector<1x6x6x1xf32>
    %c2 = arith.constant 2 : index
    %c0_6 = arith.constant 0 : index
    %17 = vector.load %arg2[%c2, %c0_6] : memref<3x128xf32, #tpu.memory_space<vmem>>, vector<1x128xf32>
    %18 = vector.shape_cast %17 : vector<1x128xf32> to vector<128xf32>
    %19 = vector.shape_cast %18 : vector<128xf32> to vector<1x1x1x128xf32>
    %20 = vector.broadcast %16 : vector<1x6x6x1xf32> to vector<1x6x6x128xf32>
    %21 = vector.broadcast %19 : vector<1x1x1x128xf32> to vector<1x6x6x128xf32>
    %22 = arith.mulf %20, %21 : vector<1x6x6x128xf32>
    %23 = arith.addf %15, %22 : vector<1x6x6x128xf32>
    %24 = vector.extract_strided_slice %23 {offsets = [0, 0, 0, 0], sizes = [1, 4, 6, 128], strides = [1, 1, 1, 1]} : vector<1x6x6x128xf32> to vector<1x4x6x128xf32>
    %25 = vector.extract_strided_slice %23 {offsets = [0, 1, 0, 0], sizes = [1, 4, 6, 128], strides = [1, 1, 1, 1]} : vector<1x6x6x128xf32> to vector<1x4x6x128xf32>
    %26 = arith.addf %24, %25 : vector<1x4x6x128xf32>
    %27 = vector.extract_strided_slice %23 {offsets = [0, 2, 0, 0], sizes = [1, 4, 6, 128], strides = [1, 1, 1, 1]} : vector<1x6x6x128xf32> to vector<1x4x6x128xf32>
    %28 = arith.addf %26, %27 : vector<1x4x6x128xf32>
    %29 = vector.extract_strided_slice %28 {offsets = [0, 0, 0, 0], sizes = [1, 4, 4, 128], strides = [1, 1, 1, 1]} : vector<1x4x6x128xf32> to vector<1x4x4x128xf32>
    %30 = vector.extract_strided_slice %28 {offsets = [0, 0, 1, 0], sizes = [1, 4, 4, 128], strides = [1, 1, 1, 1]} : vector<1x4x6x128xf32> to vector<1x4x4x128xf32>
    %31 = arith.addf %29, %30 : vector<1x4x4x128xf32>
    %32 = vector.extract_strided_slice %28 {offsets = [0, 0, 2, 0], sizes = [1, 4, 4, 128], strides = [1, 1, 1, 1]} : vector<1x4x6x128xf32> to vector<1x4x4x128xf32>
    %33 = arith.addf %31, %32 : vector<1x4x4x128xf32>
    %cst = arith.constant 0.111111112 : f32
    %34 = vector.broadcast %cst : f32 to vector<1x4x4x128xf32>
    %35 = arith.mulf %33, %34 : vector<1x4x4x128xf32>
    %c0_7 = arith.constant 0 : index
    %c0_8 = arith.constant 0 : index
    %c0_9 = arith.constant 0 : index
    %c0_10 = arith.constant 0 : index
    %36 = vector.load %arg4[%c0_7, %c0_8, %c0_9, %c0_10] : memref<1x4x4x1xf32, #tpu.memory_space<vmem>>, vector<1x4x4x1xf32>
    %c0_11 = arith.constant 0 : index
    %c0_12 = arith.constant 0 : index
    %37 = vector.load %arg3[%c0_11, %c0_12] : memref<1x128xf32, #tpu.memory_space<vmem>>, vector<1x128xf32>
    %38 = vector.shape_cast %37 : vector<1x128xf32> to vector<1x1x1x128xf32>
    %39 = vector.broadcast %36 : vector<1x4x4x1xf32> to vector<1x4x4x128xf32>
    %40 = vector.broadcast %38 : vector<1x1x1x128xf32> to vector<1x4x4x128xf32>
    %41 = arith.mulf %39, %40 : vector<1x4x4x128xf32>
    %42 = arith.addf %35, %41 : vector<1x4x4x128xf32>
    %c0_13 = arith.constant 0 : index
    %c0_14 = arith.constant 0 : index
    %c0_15 = arith.constant 0 : index
    %c0_16 = arith.constant 0 : index
    %43 = vector.load %arg5[%c0_13, %c0_14, %c0_15, %c0_16] : memref<1x4x4x128xf32, #tpu.memory_space<vmem>>, vector<1x4x4x128xf32>
    tpu.vector_store %arg5[%c0_13, %c0_14, %c0_15, %c0_16], %42 {strides = array<i32>} : memref<1x4x4x128xf32, #tpu.memory_space<vmem>>, vector<1x4x4x128xf32>,
    return
  }
  func.func @transform_0(%arg0: i32) -> (i32, i32, i32, i32) {
    %c0_i32 = arith.constant 0 : i32
    %c0_i32_0 = arith.constant 0 : i32
    %c0_i32_1 = arith.constant 0 : i32
    %c0_i32_2 = arith.constant 0 : i32
    return %arg0, %c0_i32, %c0_i32_0, %c0_i32_1 : i32, i32, i32, i32
  }
  func.func @transform_1(%arg0: i32) -> (i32, i32) {
    %c0_i32 = arith.constant 0 : i32
    %c0_i32_0 = arith.constant 0 : i32
    %c0_i32_1 = arith.constant 0 : i32
    return %c0_i32, %c0_i32_0 : i32, i32
  }
  func.func @transform_2(%arg0: i32) -> (i32, i32) {
    %c0_i32 = arith.constant 0 : i32
    %c0_i32_0 = arith.constant 0 : i32
    %c0_i32_1 = arith.constant 0 : i32
    return %c0_i32, %c0_i32_0 : i32, i32
  }
  func.func @transform_3(%arg0: i32) -> (i32, i32, i32, i32) {
    %c0_i32 = arith.constant 0 : i32
    %c0_i32_0 = arith.constant 0 : i32
    %c0_i32_1 = arith.constant 0 : i32
    %c0_i32_2 = arith.constant 0 : i32
    %c0_i32_3 = arith.constant 0 : i32
    return %c0_i32, %c0_i32_0, %c0_i32_1, %c0_i32_2 : i32, i32, i32, i32
  }
  func.func @transform_4(%arg0: i32) -> (i32, i32, i32, i32) {
    %c0_i32 = arith.constant 0 : i32
    %c0_i32_0 = arith.constant 0 : i32
    %c0_i32_1 = arith.constant 0 : i32
    %c0_i32_2 = arith.constant 0 : i32
    return %arg0, %c0_i32, %c0_i32_0, %c0_i32_1 : i32, i32, i32, i32
  }
}

module attributes {stable_mosaic.version = 11 : i64} {
  func.func @_nn_kernel(%arg0: i32, %arg1: i32, %arg2: memref<64x128xbf16, #tpu.memory_space<vmem>>, %arg3: memref<256x128xbf16, #tpu.memory_space<vmem>>, %arg4: memref<64x1xf32, #tpu.memory_space<vmem>>, %arg5: memref<1x256xf32, #tpu.memory_space<vmem>>, %arg6: memref<64x1xf32, #tpu.memory_space<vmem>>, %arg7: memref<64x1xi32, #tpu.memory_space<vmem>>) attributes {dimension_semantics = [#tpu.dimension_semantics<parallel>, #tpu.dimension_semantics<arbitrary>], iteration_bounds = array<i64: 2, 1>, scalar_prefetch = 0 : i64, scratch_operands = 0 : i64, tpu.core_type = #tpu.core_type<tc>, window_params = [{transform_indices = @transform_0, window_bounds = array<i64: 64, 128>}, {transform_indices = @transform_1, window_bounds = array<i64: 256, 128>}, {transform_indices = @transform_2, window_bounds = array<i64: 64, 1>}, {transform_indices = @transform_3, window_bounds = array<i64: 1, 256>}, {transform_indices = @transform_4, window_bounds = array<i64: 64, 1>}, {transform_indices = @transform_5, window_bounds = array<i64: 64, 1>}]} {
    %c0_i32 = arith.constant 0 : i32
    %0 = arith.cmpi eq, %arg1, %c0_i32 : i32
    %1 = arith.extui %0 : i1 to i32
    %c0_i32_0 = arith.constant 0 : i32
    %2 = arith.cmpi ne, %1, %c0_i32_0 : i32
    scf.if %2 {
      %cst_24 = arith.constant 0x7F800000 : f32
      %39 = vector.broadcast %cst_24 : f32 to vector<64x1xf32>
      %c0_25 = arith.constant 0 : index
      %c0_26 = arith.constant 0 : index
      %40 = vector.load %arg6[%c0_25, %c0_26] : memref<64x1xf32, #tpu.memory_space<vmem>>, vector<64x1xf32>
      tpu.vector_store %arg6[%c0_25, %c0_26], %39 {strides = array<i32>} : memref<64x1xf32, #tpu.memory_space<vmem>>, vector<64x1xf32>,
      %c0_i32_27 = arith.constant 0 : i32
      %41 = vector.broadcast %c0_i32_27 : i32 to vector<64x1xi32>
      %c0_28 = arith.constant 0 : index
      %c0_29 = arith.constant 0 : index
      %42 = vector.load %arg7[%c0_28, %c0_29] : memref<64x1xi32, #tpu.memory_space<vmem>>, vector<64x1xi32>
      tpu.vector_store %arg7[%c0_28, %c0_29], %41 {strides = array<i32>} : memref<64x1xi32, #tpu.memory_space<vmem>>, vector<64x1xi32>,
    } else {
    }
    %c0 = arith.constant 0 : index
    %c0_1 = arith.constant 0 : index
    %3 = vector.load %arg2[%c0, %c0_1] : memref<64x128xbf16, #tpu.memory_space<vmem>>, vector<64x128xbf16>
    %c0_2 = arith.constant 0 : index
    %c0_3 = arith.constant 0 : index
    %4 = vector.load %arg3[%c0_2, %c0_3] : memref<256x128xbf16, #tpu.memory_space<vmem>>, vector<256x128xbf16>
    %cst = arith.constant dense<0.000000e+00> : vector<64x256xf32>
    %5 = tpu.matmul %3, %4, %cst {dimension_numbers = #tpu.dot_dimension_numbers<[1], [1], [0], [0], [0, 0, 1, 0], [], []>} : vector<64x128xbf16>, vector<256x128xbf16>, vector<64x256xf32> -> vector<64x256xf32>
    %c0_4 = arith.constant 0 : index
    %c0_5 = arith.constant 0 : index
    %6 = vector.load %arg4[%c0_4, %c0_5] : memref<64x1xf32, #tpu.memory_space<vmem>>, vector<64x1xf32>
    %cst_6 = arith.constant 2.000000e+00 : f32
    %7 = vector.broadcast %cst_6 : f32 to vector<64x256xf32>
    %8 = arith.mulf %7, %5 : vector<64x256xf32>
    %9 = vector.broadcast %6 : vector<64x1xf32> to vector<64x256xf32>
    %10 = arith.subf %9, %8 : vector<64x256xf32>
    %c0_7 = arith.constant 0 : index
    %c0_8 = arith.constant 0 : index
    %11 = vector.load %arg5[%c0_7, %c0_8] : memref<1x256xf32, #tpu.memory_space<vmem>>, vector<1x256xf32>
    %12 = vector.broadcast %11 : vector<1x256xf32> to vector<64x256xf32>
    %13 = arith.addf %10, %12 : vector<64x256xf32>
    %cst_9 = arith.constant 0.000000e+00 : f32
    %14 = vector.broadcast %cst_9 : f32 to vector<64x256xf32>
    %15 = arith.maximumf %13, %14 : vector<64x256xf32>
    %cst_10 = arith.constant dense<0x7F800000> : vector<64xf32>
    %16 = vector.multi_reduction <minimumf>, %15, %cst_10 [1] : vector<64x256xf32> to vector<64xf32>
    %17 = vector.shape_cast %16 : vector<64xf32> to vector<64x1xf32>
    %18 = tpu.iota {dimensions = array<i32: 1>} : vector<64x256xi32>
    %c256_i32 = arith.constant 256 : i32
    %19 = arith.muli %arg1, %c256_i32 : i32
    %20 = vector.broadcast %19 : i32 to vector<64x256xi32>
    %21 = arith.addi %18, %20 : vector<64x256xi32>
    %22 = vector.broadcast %17 : vector<64x1xf32> to vector<64x256xf32>
    %23 = arith.cmpf ole, %15, %22 : vector<64x256xf32>
    %c1073741824_i32 = arith.constant 1073741824 : i32
    %24 = vector.broadcast %c1073741824_i32 : i32 to vector<64x256xi32>
    %25 = arith.select %23, %21, %24 : vector<64x256xi1>, vector<64x256xi32>
    %cst_11 = arith.constant dense<2147483647> : vector<64xi32>
    %26 = vector.multi_reduction <minsi>, %25, %cst_11 [1] : vector<64x256xi32> to vector<64xi32>
    %27 = vector.shape_cast %26 : vector<64xi32> to vector<64x1xi32>
    %c0_12 = arith.constant 0 : index
    %c0_13 = arith.constant 0 : index
    %28 = vector.load %arg6[%c0_12, %c0_13] : memref<64x1xf32, #tpu.memory_space<vmem>>, vector<64x1xf32>
    %29 = arith.cmpf olt, %17, %28 : vector<64x1xf32>
    %c0_14 = arith.constant 0 : index
    %c0_15 = arith.constant 0 : index
    %30 = vector.load %arg7[%c0_14, %c0_15] : memref<64x1xi32, #tpu.memory_space<vmem>>, vector<64x1xi32>
    %31 = arith.select %29, %27, %30 : vector<64x1xi1>, vector<64x1xi32>
    %c0_16 = arith.constant 0 : index
    %c0_17 = arith.constant 0 : index
    %32 = vector.load %arg7[%c0_16, %c0_17] : memref<64x1xi32, #tpu.memory_space<vmem>>, vector<64x1xi32>
    tpu.vector_store %arg7[%c0_16, %c0_17], %31 {strides = array<i32>} : memref<64x1xi32, #tpu.memory_space<vmem>>, vector<64x1xi32>,
    %c0_18 = arith.constant 0 : index
    %c0_19 = arith.constant 0 : index
    %33 = vector.load %arg6[%c0_18, %c0_19] : memref<64x1xf32, #tpu.memory_space<vmem>>, vector<64x1xf32>
    %34 = arith.select %29, %17, %33 : vector<64x1xi1>, vector<64x1xf32>
    %c0_20 = arith.constant 0 : index
    %c0_21 = arith.constant 0 : index
    %35 = vector.load %arg6[%c0_20, %c0_21] : memref<64x1xf32, #tpu.memory_space<vmem>>, vector<64x1xf32>
    tpu.vector_store %arg6[%c0_20, %c0_21], %34 {strides = array<i32>} : memref<64x1xf32, #tpu.memory_space<vmem>>, vector<64x1xf32>,
    %c0_i32_22 = arith.constant 0 : i32
    %36 = arith.cmpi eq, %arg1, %c0_i32_22 : i32
    %37 = arith.extui %36 : i1 to i32
    %c0_i32_23 = arith.constant 0 : i32
    %38 = arith.cmpi ne, %37, %c0_i32_23 : i32
    scf.if %38 {
      %c0_24 = arith.constant 0 : index
      %c0_25 = arith.constant 0 : index
      %39 = vector.load %arg6[%c0_24, %c0_25] : memref<64x1xf32, #tpu.memory_space<vmem>>, vector<64x1xf32>
      %40 = math.sqrt %39 : vector<64x1xf32>
      %c0_26 = arith.constant 0 : index
      %c0_27 = arith.constant 0 : index
      %41 = vector.load %arg6[%c0_26, %c0_27] : memref<64x1xf32, #tpu.memory_space<vmem>>, vector<64x1xf32>
      tpu.vector_store %arg6[%c0_26, %c0_27], %40 {strides = array<i32>} : memref<64x1xf32, #tpu.memory_space<vmem>>, vector<64x1xf32>,
    } else {
    }
    return
  }
  func.func @transform_0(%arg0: i32, %arg1: i32) -> (i32, i32) {
    %c0_i32 = arith.constant 0 : i32
    %c0_i32_0 = arith.constant 0 : i32
    return %arg0, %c0_i32 : i32, i32
  }
  func.func @transform_1(%arg0: i32, %arg1: i32) -> (i32, i32) {
    %c0_i32 = arith.constant 0 : i32
    %c0_i32_0 = arith.constant 0 : i32
    return %arg1, %c0_i32 : i32, i32
  }
  func.func @transform_2(%arg0: i32, %arg1: i32) -> (i32, i32) {
    %c0_i32 = arith.constant 0 : i32
    %c0_i32_0 = arith.constant 0 : i32
    return %arg0, %c0_i32 : i32, i32
  }
  func.func @transform_3(%arg0: i32, %arg1: i32) -> (i32, i32) {
    %c0_i32 = arith.constant 0 : i32
    %c0_i32_0 = arith.constant 0 : i32
    return %c0_i32, %arg1 : i32, i32
  }
  func.func @transform_4(%arg0: i32, %arg1: i32) -> (i32, i32) {
    %c0_i32 = arith.constant 0 : i32
    %c0_i32_0 = arith.constant 0 : i32
    return %arg0, %c0_i32 : i32, i32
  }
  func.func @transform_5(%arg0: i32, %arg1: i32) -> (i32, i32) {
    %c0_i32 = arith.constant 0 : i32
    %c0_i32_0 = arith.constant 0 : i32
    return %arg0, %c0_i32 : i32, i32
  }
}

module attributes {stable_mosaic.version = 11 : i64} {
  func.func @_sqdist_kernel(%arg0: i32, %arg1: memref<2x128xbf16, #tpu.memory_space<vmem>>, %arg2: memref<2x1xf32, #tpu.memory_space<vmem>>, %arg3: memref<256x128xbf16, #tpu.memory_space<vmem>>, %arg4: memref<1x256xf32, #tpu.memory_space<vmem>>, %arg5: memref<2x256xf32, #tpu.memory_space<vmem>>) attributes {dimension_semantics = [#tpu.dimension_semantics<parallel>], iteration_bounds = array<i64: 1>, scalar_prefetch = 0 : i64, scratch_operands = 0 : i64, tpu.core_type = #tpu.core_type<tc>, window_params = [{pipeline_mode = #tpu.pipeline_mode<synchronous>, transform_indices = @transform_0, window_bounds = array<i64: 2, 128>}, {pipeline_mode = #tpu.pipeline_mode<synchronous>, transform_indices = @transform_1, window_bounds = array<i64: 2, 1>}, {transform_indices = @transform_2, window_bounds = array<i64: 256, 128>}, {transform_indices = @transform_3, window_bounds = array<i64: 1, 256>}, {transform_indices = @transform_4, window_bounds = array<i64: 2, 256>}]} {
    %c0 = arith.constant 0 : index
    %c0_0 = arith.constant 0 : index
    %0 = vector.load %arg1[%c0, %c0_0] : memref<2x128xbf16, #tpu.memory_space<vmem>>, vector<2x128xbf16>
    %c0_1 = arith.constant 0 : index
    %c0_2 = arith.constant 0 : index
    %1 = vector.load %arg3[%c0_1, %c0_2] : memref<256x128xbf16, #tpu.memory_space<vmem>>, vector<256x128xbf16>
    %cst = arith.constant dense<0.000000e+00> : vector<2x256xf32>
    %2 = tpu.matmul %0, %1, %cst {dimension_numbers = #tpu.dot_dimension_numbers<[1], [1], [0], [0], [0, 0, 1, 0], [], []>} : vector<2x128xbf16>, vector<256x128xbf16>, vector<2x256xf32> -> vector<2x256xf32>
    %c0_3 = arith.constant 0 : index
    %c0_4 = arith.constant 0 : index
    %3 = vector.load %arg2[%c0_3, %c0_4] : memref<2x1xf32, #tpu.memory_space<vmem>>, vector<2x1xf32>
    %cst_5 = arith.constant 2.000000e+00 : f32
    %4 = vector.broadcast %cst_5 : f32 to vector<2x256xf32>
    %5 = arith.mulf %4, %2 : vector<2x256xf32>
    %6 = vector.broadcast %3 : vector<2x1xf32> to vector<2x256xf32>
    %7 = arith.subf %6, %5 : vector<2x256xf32>
    %c0_6 = arith.constant 0 : index
    %c0_7 = arith.constant 0 : index
    %8 = vector.load %arg4[%c0_6, %c0_7] : memref<1x256xf32, #tpu.memory_space<vmem>>, vector<1x256xf32>
    %9 = vector.broadcast %8 : vector<1x256xf32> to vector<2x256xf32>
    %10 = arith.addf %7, %9 : vector<2x256xf32>
    %cst_8 = arith.constant 0.000000e+00 : f32
    %11 = vector.broadcast %cst_8 : f32 to vector<2x256xf32>
    %12 = arith.maximumf %10, %11 : vector<2x256xf32>
    %c0_9 = arith.constant 0 : index
    %c0_10 = arith.constant 0 : index
    %13 = vector.load %arg5[%c0_9, %c0_10] : memref<2x256xf32, #tpu.memory_space<vmem>>, vector<2x256xf32>
    tpu.vector_store %arg5[%c0_9, %c0_10], %12 {strides = array<i32>} : memref<2x256xf32, #tpu.memory_space<vmem>>, vector<2x256xf32>,
    return
  }
  func.func @transform_0(%arg0: i32) -> (i32, i32) {
    %c0_i32 = arith.constant 0 : i32
    %c0_i32_0 = arith.constant 0 : i32
    %c0_i32_1 = arith.constant 0 : i32
    return %c0_i32, %c0_i32_0 : i32, i32
  }
  func.func @transform_1(%arg0: i32) -> (i32, i32) {
    %c0_i32 = arith.constant 0 : i32
    %c0_i32_0 = arith.constant 0 : i32
    %c0_i32_1 = arith.constant 0 : i32
    return %c0_i32, %c0_i32_0 : i32, i32
  }
  func.func @transform_2(%arg0: i32) -> (i32, i32) {
    %c0_i32 = arith.constant 0 : i32
    %c0_i32_0 = arith.constant 0 : i32
    return %arg0, %c0_i32 : i32, i32
  }
  func.func @transform_3(%arg0: i32) -> (i32, i32) {
    %c0_i32 = arith.constant 0 : i32
    %c0_i32_0 = arith.constant 0 : i32
    return %c0_i32, %arg0 : i32, i32
  }
  func.func @transform_4(%arg0: i32) -> (i32, i32) {
    %c0_i32 = arith.constant 0 : i32
    %c0_i32_0 = arith.constant 0 : i32
    return %c0_i32, %arg0 : i32, i32
  }
}

module attributes {stable_mosaic.version = 11 : i64} {
  func.func @_amap_kernel(%arg0: i32, %arg1: memref<1x8x8xbf16, #tpu.memory_space<vmem>>, %arg2: memref<48x8xbf16, #tpu.memory_space<vmem>>, %arg3: memref<8x48xbf16, #tpu.memory_space<vmem>>, %arg4: memref<1x48x48xf32, #tpu.memory_space<vmem>>) attributes {dimension_semantics = [#tpu.dimension_semantics<parallel>], iteration_bounds = array<i64: 2>, scalar_prefetch = 0 : i64, scratch_operands = 0 : i64, tpu.core_type = #tpu.core_type<tc>, window_params = [{transform_indices = @transform_0, window_bounds = array<i64: 1, 8, 8>}, {pipeline_mode = #tpu.pipeline_mode<synchronous>, transform_indices = @transform_1, window_bounds = array<i64: 48, 8>}, {pipeline_mode = #tpu.pipeline_mode<synchronous>, transform_indices = @transform_2, window_bounds = array<i64: 8, 48>}, {transform_indices = @transform_3, window_bounds = array<i64: 1, 48, 48>}]} {
    %c0 = arith.constant 0 : index
    %c0_0 = arith.constant 0 : index
    %0 = vector.load %arg2[%c0, %c0_0] : memref<48x8xbf16, #tpu.memory_space<vmem>>, vector<48x8xbf16>
    %c0_1 = arith.constant 0 : index
    %c0_2 = arith.constant 0 : index
    %c0_3 = arith.constant 0 : index
    %1 = vector.load %arg1[%c0_1, %c0_2, %c0_3] : memref<1x8x8xbf16, #tpu.memory_space<vmem>>, vector<1x8x8xbf16>
    %2 = vector.shape_cast %1 : vector<1x8x8xbf16> to vector<8x8xbf16>
    %cst = arith.constant dense<0.000000e+00> : vector<48x8xf32>
    %3 = tpu.matmul %0, %2, %cst {dimension_numbers = #tpu.dot_dimension_numbers<[1], [0], [0], [1], [0, 0, 1, 1], [], []>} : vector<48x8xbf16>, vector<8x8xbf16>, vector<48x8xf32> -> vector<48x8xf32>
    %4 = arith.truncf %3 : vector<48x8xf32> to vector<48x8xbf16>
    %c0_4 = arith.constant 0 : index
    %c0_5 = arith.constant 0 : index
    %5 = vector.load %arg3[%c0_4, %c0_5] : memref<8x48xbf16, #tpu.memory_space<vmem>>, vector<8x48xbf16>
    %cst_6 = arith.constant dense<0.000000e+00> : vector<48x48xf32>
    %6 = tpu.matmul %4, %5, %cst_6 {dimension_numbers = #tpu.dot_dimension_numbers<[1], [0], [0], [1], [0, 0, 1, 1], [], []>} : vector<48x8xbf16>, vector<8x48xbf16>, vector<48x48xf32> -> vector<48x48xf32>
    %c0_7 = arith.constant 0 : index
    %c0_8 = arith.constant 0 : index
    %c0_9 = arith.constant 0 : index
    %7 = vector.load %arg4[%c0_7, %c0_8, %c0_9] : memref<1x48x48xf32, #tpu.memory_space<vmem>>, vector<1x48x48xf32>
    %8 = vector.shape_cast %7 : vector<1x48x48xf32> to vector<48x48xf32>
    %9 = vector.shape_cast %6 : vector<48x48xf32> to vector<1x48x48xf32>
    tpu.vector_store %arg4[%c0_7, %c0_8, %c0_9], %9 {strides = array<i32>} : memref<1x48x48xf32, #tpu.memory_space<vmem>>, vector<1x48x48xf32>,
    return
  }
  func.func @transform_0(%arg0: i32) -> (i32, i32, i32) {
    %c0_i32 = arith.constant 0 : i32
    %c0_i32_0 = arith.constant 0 : i32
    %c0_i32_1 = arith.constant 0 : i32
    return %arg0, %c0_i32, %c0_i32_0 : i32, i32, i32
  }
  func.func @transform_1(%arg0: i32) -> (i32, i32) {
    %c0_i32 = arith.constant 0 : i32
    %c0_i32_0 = arith.constant 0 : i32
    %c0_i32_1 = arith.constant 0 : i32
    return %c0_i32, %c0_i32_0 : i32, i32
  }
  func.func @transform_2(%arg0: i32) -> (i32, i32) {
    %c0_i32 = arith.constant 0 : i32
    %c0_i32_0 = arith.constant 0 : i32
    %c0_i32_1 = arith.constant 0 : i32
    return %c0_i32, %c0_i32_0 : i32, i32
  }
  func.func @transform_3(%arg0: i32) -> (i32, i32, i32) {
    %c0_i32 = arith.constant 0 : i32
    %c0_i32_0 = arith.constant 0 : i32
    %c0_i32_1 = arith.constant 0 : i32
    return %arg0, %c0_i32, %c0_i32_0 : i32, i32, i32
  }
}

</mosaic_0001>

<bundles_post_ra>
// kernel: classifier_patchcore_forward.6
= control target key start
LH: loop header
LB: loop body
LE: loop exit
PB: predicated region body
PF: predicated region fallthrough
CT: control target
= control target key end

     0   :  { %s537_s15 = smov 0   ;;  %s582_s0 = inlined_call_operand.vmem [shape: f32[2,6,6,3], index: 0, kind: input, shape index: {}]   ;;  %s583_s1 = inlined_call_operand.vmem [shape: f32[3,128], index: 1, kind: input, shape index: {}]   ;;  %s584_s2 = inlined_call_operand.vmem [shape: f32[1,128], index: 2, kind: input, shape index: {}]   ;;  %s585_s3 = inlined_call_operand.vmem [shape: f32[1,4,4,1], index: 3, kind: input, shape index: {}]   ;;  %s586_s4 = inlined_call_operand.vmem [shape: f32[2,4,4,128], index: 4, kind: output, shape index: {}]  }
   0x1 LB: > { %s465_s16 = sadd.s32 4294967295, %s507_s15   ;;  %p469_p0 = scmp.ge.s32.totalorder %s507_s15, 1  ;;  %s507_s15 = sphi %s537_s15, %s14_s15  }
   0x2   : > { %p162_p1 = scmp.lt.s32.totalorder %s507_s15, 3 }
   0x4   : > { %p163_p2 = pnand %p469_p0, %p162_p1 }
   0x5   : > { %p188_p3 = scmp.lt.s32.totalorder (!%p163_p2), %s465_s16, 1  ;;  %v509_v0 = vmov (!%p163_p2), 0   ;;  %v510_v6 = vmov (!%p163_p2), 1   ;;  %v511_v8 = vmov (!%p163_p2), 2   ;;  %v367_v9 = vld [vmem:[%s585_s3] sm:$0xf] (!%p163_p2) }
   0x6   : > { %166 = sbr.rel (%p163_p2) target bundleno = 202 (0xca), region = 36  ;;  %493 = vset.pattern.permute.xlu1 (!%p163_p2), %v509_v0  ;;  %492 = vset.pattern.permute.xlu0 (!%p163_p2), %v509_v0  ;;  %v370_v10 = vld [vmem:[%s585_s3 + $0xc] sm:$0xf] (!%p163_p2)  ;;  %v368_v11 = vld [vmem:[%s585_s3 + $0x4] sm:$0xf] (!%p163_p2) }
   0x7   : > { %v369_v12 = vld [vmem:[%s585_s3 + $0x8] sm:$0xf] (!%p163_p2)  ;;  %v474_v23 = vld [vmem:[%s583_s1 + $0x1] ss:$0 sm:$0xff] (!%p163_p2)  ;;  %v475_v28 = vld [vmem:[%s583_s1 + $0x2] ss:$0 sm:$0xff] (!%p163_p2) }
   0x8   : > { %v473_v29 = vld [vmem:[%s583_s1] ss:$0 sm:$0xff] (!%p163_p2) }
   0xd   : > { %s588_s16 = smov (!%p188_p3, %s465_s16), 1 }
   0xe   : > { %s480_s17 = smul.u32 48, %s588_s16  ;;  %s479_s11 = sshll.u32 %s588_s16, 4 }
   0xf   : > { %s197_s14 = scalar_lea.vmem %s586_s4, %s479_s11 }
  0x10   : > { %s192_s20 = scalar_lea.vmem %s582_s0, %s480_s17 }
  0x11   : > { %v200_v1 = vld [vmem:[%s192_s20 + $0x10] sm:$0x3f]  ;;  %v198_v2 = vld [vmem:[%s192_s20] sm:$0x3f]  ;;  %v201_v3 = vld [vmem:[%s192_s20 + $0x18] sm:$0x3f] }
  0x12   : > { %217 = vperm.xlu1 %493, %v200_v1   ;;  %207 = vperm.xlu0 %492, %v198_v2   ;;  %v199_v4 = vld [vmem:[%s192_s20 + $0x8] sm:$0x3f]  ;;  %v202_v5 = vld [vmem:[%s192_s20 + $0x20] sm:$0x3f] }
  0x13   : > { %v203_v7 = vld [vmem:[%s192_s20 + $0x28] sm:$0x3f] }
  0x16   : > { %222 = vperm.xlu1 %493, %v201_v3   ;;  %212 = vperm.xlu0 %492, %v199_v4  }
  0x1a   : > { %494 = vset.pattern.permute.xlu1 %v510_v6  ;;  %227 = vperm.xlu0 %492, %v202_v5  }
  0x1b   : > { %247 = vperm.xlu1 %494, %v198_v2  }
  0x1e   : > { %495 = vset.pattern.permute.xlu0 %v510_v6 }
  0x1f   : > { %255 = vperm.xlu1 %494, %v200_v1   ;;  %251 = vperm.xlu0 %495, %v199_v4  }
  0x23   : > { %259 = vperm.xlu1 %494, %v201_v3   ;;  %263 = vperm.xlu0 %495, %v202_v5  }
  0x27   : > { %496 = vset.pattern.permute.xlu1 %v509_v0  ;;  %267 = vperm.xlu0 %495, %v203_v7  }
  0x28   : > { %232 = vperm.xlu1 %496, %v203_v7  }
  0x2b   : > { %498 = vset.pattern.permute.xlu0 %v511_v8 }
  0x2c   : > { %497 = vset.pattern.permute.xlu1 %v511_v8  ;;  %292 = vperm.xlu0 %498, %v199_v4  }
  0x2d   : > { %288 = vperm.xlu1 %497, %v198_v2  }
  0x30   : > { %304 = vperm.xlu0 %498, %v202_v5   ;;  %v476_v5 = vld [vmem:[%s584_s2] ss:$0 sm:$0xff] }
  0x31   : > { %296 = vperm.xlu1 %497, %v200_v1  }
  0x34   : > { %499 = vset.pattern.permute.xlu0 %v509_v0 }
  0x35   : > { %300 = vperm.xlu1 %497, %v201_v3   ;;  %374 = vperm.xlu0 %499, %v367_v9  }
  0x39   : > { %308 = vperm.xlu1 %497, %v203_v7   ;;  %389 = vperm.xlu0 %499, %v370_v10  }
  0x3d   : > { %500 = vset.pattern.permute.xlu1 %v509_v0 }
  0x3e   : > { %379 = vperm.xlu1 %500, %v368_v11  }
  0x42   : > { %384 = vperm.xlu1 %500, %v369_v12  }
  0x91   : > { %v218_v13 = vpop.permute.xlu1 %217  ;;  %v208_v14 = vpop.permute.xlu0 %207 }
  0x92   : > { %v239_v30 = vmul.f32 %v473_v29, %v208_v14  ;;  %v241_v39 = vmul.f32 %v473_v29, %v218_v13 }
  0x95   : > { %v223_v15 = vpop.permute.xlu1 %222  ;;  %v213_v16 = vpop.permute.xlu0 %212 }
  0x96   : > { %v240_v31 = vmul.f32 %v473_v29, %v213_v16  ;;  %v242_v47 = vmul.f32 %v473_v29, %v223_v15 }
  0x99   : > { %v228_v17 = vpop.permute.xlu0 %227 }
  0x9a   : > { %v248_v18 = vpop.permute.xlu1 %247  ;;  %v243_v51 = vmul.f32 %v473_v29, %v228_v17 }
  0x9b   : > { %v274_v26 = vmul.f32 %v474_v23, %v248_v18 }
  0x9d   : > { %v280_v35 = vadd.f32 %v274_v26, %v239_v30 }
  0x9e   : > { %v256_v19 = vpop.permute.xlu1 %255  ;;  %v252_v20 = vpop.permute.xlu0 %251 }
  0x9f   : > { %v275_v27 = vmul.f32 %v474_v23, %v252_v20  ;;  %v276_v36 = vmul.f32 %v474_v23, %v256_v19 }
  0xa1   : > { %v281_v37 = vadd.f32 %v275_v27, %v240_v31  ;;  %v282_v43 = vadd.f32 %v276_v36, %v241_v39 }
  0xa2   : > { %v260_v21 = vpop.permute.xlu1 %259  ;;  %v264_v22 = vpop.permute.xlu0 %263 }
  0xa3   : > { %v277_v44 = vmul.f32 %v474_v23, %v260_v21  ;;  %v278_v48 = vmul.f32 %v474_v23, %v264_v22 }
  0xa5   : > { %v283_v55 = vadd.f32 %v277_v44, %v242_v47  ;;  %v284_v59 = vadd.f32 %v278_v48, %v243_v51 }
  0xa6   : > { %v268_v24 = vpop.permute.xlu0 %267 }
  0xa7   : > { %v233_v25 = vpop.permute.xlu1 %232  ;;  %v279_v52 = vmul.f32 %v474_v23, %v268_v24 }
  0xa8   : > { %v244_v53 = vmul.f32 %v473_v29, %v233_v25 }
  0xaa   : > { %v285_v63 = vadd.f32 %v279_v52, %v244_v53 }
  0xab   : > { %v293_v32 = vpop.permute.xlu0 %292 }
  0xac   : > { %v316_v33 = vmul.f32 %v475_v28, %v293_v32  ;;  %v289_v34 = vpop.permute.xlu1 %288 }
  0xad   : > { %v315_v38 = vmul.f32 %v475_v28, %v289_v34 }
  0xae   : > { %v322_v40 = vadd.f32 %v316_v33, %v281_v37 }
  0xaf   : > { %v321_v41 = vadd.f32 %v315_v38, %v280_v35  ;;  %v305_v46 = vpop.permute.xlu0 %304 }
  0xb0   : > { %v297_v42 = vpop.permute.xlu1 %296  ;;  %v319_v56 = vmul.f32 %v475_v28, %v305_v46 }
  0xb1   : > { %v317_v45 = vmul.f32 %v475_v28, %v297_v42  ;;  %v327_v49 = vadd.f32 %v322_v40, %v321_v41 }
  0xb2   : > { %v325_v1 = vadd.f32 %v319_v56, %v284_v59 }
  0xb3   : > { %v323_v50 = vadd.f32 %v317_v45, %v282_v43 }
  0xb4   : > { %v301_v54 = vpop.permute.xlu1 %300  ;;  %v375_v6 = vpop.permute.xlu0 %374 }
  0xb5   : > { %v331_v57 = vadd.f32 %v327_v49, %v323_v50  ;;  %v318_v58 = vmul.f32 %v475_v28, %v301_v54  ;;  %v328_v60 = vadd.f32 %v323_v50, %v322_v40  ;;  %v398_v14 = vmul.f32 %v476_v5, %v375_v6 }
  0xb7   : > { %v324_v61 = vadd.f32 %v318_v58, %v283_v55  ;;  %v339_v62 = vrot.slane %v331_v57, 1  ;;  %v351_v8 = vrot.slane %v331_v57, 2 }
  0xb8   : > { %v309_v0 = vpop.permute.xlu1 %308  ;;  %v390_v32 = vpop.permute.xlu0 %389 }
  0xb9   : > { %v329_v2 = vadd.f32 %v324_v61, %v323_v50  ;;  %v332_v3 = vadd.f32 %v328_v60, %v324_v61  ;;  %v320_v4 = vmul.f32 %v475_v28, %v309_v0  ;;  %v347_v7 = vadd.f32 %v339_v62, %v331_v57 }
  0xba   : > { %v330_v11 = vadd.f32 %v325_v1, %v324_v61  ;;  %v401_v38 = vmul.f32 %v476_v5, %v390_v32 }
  0xbb   : > { %v333_v9 = vadd.f32 %v329_v2, %v325_v1  ;;  %v326_v10 = vadd.f32 %v320_v4, %v285_v63  ;;  %v340_v12 = vrot.slane %v332_v3, 1  ;;  %v359_v13 = vadd.f32 %v351_v8, %v347_v7 }
  0xbc   : > { %v352_v18 = vrot.slane %v332_v3, 2 }
  0xbd   : > { %v334_v15 = vadd.f32 %v330_v11, %v326_v10  ;;  %v380_v16 = vpop.permute.xlu1 %379  ;;  %v348_v17 = vadd.f32 %v340_v12, %v332_v3  ;;  %v341_v19 = vrot.slane %v333_v9, 1  ;;  %v363_v20 = vmul.f32 0.11111111, %v359_v13 }
  0xbe   : > { %v353_v21 = vrot.slane %v333_v9, 2  ;;  %v399_v23 = vmul.f32 %v476_v5, %v380_v16 }
  0xbf   : > { %v360_v22 = vadd.f32 %v352_v18, %v348_v17  ;;  %v342_v24 = vrot.slane %v334_v15, 1  ;;  %v349_v25 = vadd.f32 %v341_v19, %v333_v9  ;;  %v402_v26 = vadd.f32 %v398_v14, %v363_v20 }
  0xc0   : > { %v354_v29 = vrot.slane %v334_v15, 2 }
  0xc1   : > { %v364_v27 = vmul.f32 0.11111111, %v360_v22  ;;  %v350_v28 = vadd.f32 %v342_v24, %v334_v15  ;;  %v385_v30 = vpop.permute.xlu1 %384  ;;  %v361_v31 = vadd.f32 %v353_v21, %v349_v25  ;;  %406 = vst [vmem:[%s197_s14] sm:$0xf] %v402_v26 }
  0xc2   : > { %v400_v33 = vmul.f32 %v476_v5, %v385_v30 }
  0xc3   : > { %v403_v34 = vadd.f32 %v399_v23, %v364_v27  ;;  %v362_v35 = vadd.f32 %v354_v29, %v350_v28  ;;  %v365_v36 = vmul.f32 0.11111111, %v361_v31 }
  0xc5   : > { %407 = vst [vmem:[%s197_s14 + $0x4] sm:$0xf] %v403_v34  ;;  %v366_v37 = vmul.f32 0.11111111, %v362_v35  ;;  %v404_v39 = vadd.f32 %v400_v33, %v365_v36 }
  0xc7   : > { %v405_v40 = vadd.f32 %v401_v38, %v366_v37  ;;  %408 = vst [vmem:[%s197_s14 + $0x8] sm:$0xf] %v404_v39 }
  0xc9   : > { %409 = vst [vmem:[%s197_s14 + $0xc] sm:$0xf] %v405_v40 }
  0xca PF: > { %s14_s15 = sadd.s32 1, %s507_s15  }
  0xcb   : > { %p11_p4 = scmp.ge.s32.totalorder %s14_s15, 4  }
  0xcd   :  { %13 = sbr.rel (!%p11_p4) target bundleno = 1 (0x1), region = 66 }

// kernel: classifier_patchcore_forward.5
= control target key start
LH: loop header
LB: loop body
LE: loop exit
PB: predicated region body
PF: predicated region fallthrough
CT: control target
= control target key end

     0   :  { %s935_s15 = smov 0   ;;  %s1215_s0 = inlined_call_operand.vmem [shape: f32[2,10,10,3], index: 0, kind: input, shape index: {}]   ;;  %s1216_s1 = inlined_call_operand.vmem [shape: f32[3,128], index: 1, kind: input, shape index: {}]   ;;  %s1217_s2 = inlined_call_operand.vmem [shape: f32[1,128], index: 2, kind: input, shape index: {}]   ;;  %s1218_s3 = inlined_call_operand.vmem [shape: f32[1,8,8,1], index: 3, kind: input, shape index: {}]   ;;  %s1219_s4 = inlined_call_operand.vmem [shape: f32[2,8,8,128], index: 4, kind: output, shape index: {}]  }
   0x1 LB: > { %s865_s16 = sadd.s32 4294967295, %s905_s15   ;;  %p869_p0 = scmp.ge.s32.totalorder %s905_s15, 1  ;;  %s905_s15 = sphi %s935_s15, %s14_s15  }
   0x2   : > { %p162_p1 = scmp.lt.s32.totalorder %s905_s15, 3 }
   0x4   : > { %p163_p2 = pnand %p869_p0, %p162_p1 }
   0x5   : > { %p188_p3 = scmp.lt.s32.totalorder (!%p163_p2), %s865_s16, 1  ;;  %v907_v0 = vmov (!%p163_p2), 1   ;;  %v908_v1 = vmov (!%p163_p2), 0   ;;  %v909_v14 = vmov (!%p163_p2), 2   ;;  %v731_v23 = vld [vmem:[%s1218_s3] sm:$0xff] (!%p163_p2)  ;;  %v734_v24 = vld [vmem:[%s1218_s3 + $0x18] sm:$0xff] (!%p163_p2) }
   0x6   : > { %166 = sbr.rel (%p163_p2) target bundleno = 290 (0x122), region = 36  ;;  %893 = vset.pattern.permute.xlu0 (!%p163_p2), %v907_v0  ;;  %892 = vset.pattern.permute.xlu1 (!%p163_p2), %v908_v1  ;;  %v736_v25 = vld [vmem:[%s1218_s3 + $0x28] sm:$0xff] (!%p163_p2)  ;;  %v738_v29 = vld [vmem:[%s1218_s3 + $0x38] sm:$0xff] (!%p163_p2)  ;;  %v733_v30 = vld [vmem:[%s1218_s3 + $0x10] sm:$0xff] (!%p163_p2)  ;;  %vm641_vm0 = vcmask (!%p163_p2), 1046528   ;;  %vm682_vm1 = vcmask (!%p163_p2), 1045504  }
   0x7   : > { %v732_v26 = vld [vmem:[%s1218_s3 + $0x8] sm:$0xff] (!%p163_p2)  ;;  %v1019_v31 = vld [vmem:[%s1216_s1 + $0x1] ss:$0 sm:$0xff] (!%p163_p2)  ;;  %v1024_v32 = vld [vmem:[%s1216_s1] ss:$0 sm:$0xff] (!%p163_p2) }
   0x8   : > { %v735_v37 = vld [vmem:[%s1218_s3 + $0x20] sm:$0xff] (!%p163_p2)  ;;  %v737_v43 = vld [vmem:[%s1218_s3 + $0x30] sm:$0xff] (!%p163_p2) }
   0xd   : > { %s1221_s16 = smov (!%p188_p3, %s865_s16), 1 }
   0xe   : > { %s880_s17 = smul.u32 160, %s1221_s16  ;;  %s879_s21 = sshll.u32 %s1221_s16, 6 }
   0xf   : > { %s1173_s23 = scalar_lea.vmem %s1219_s4, %s879_s21 }
  0x10   : > { %s950_s20 = scalar_lea.vmem %s1215_s0, %s880_s17 }
  0x11   : > { %v953_v2 = vld [vmem:[%s950_s20 + $0x10] sm:$0xff]  ;;  %v956_v3 = vld [vmem:[%s950_s20] sm:$0xff]  ;;  %v961_v4 = vld [vmem:[%s950_s20 + $0x18] sm:$0x3] }
  0x12   : > { %231 = vperm.xlu1 %892, %v953_v2   ;;  %345 = vperm.xlu0 %893, %v956_v3   ;;  %v966_v5 = vld [vmem:[%s950_s20 + $0x28] sm:$0x3]  ;;  %v205_v6 = vld [vmem:[%s950_s20 + $0x38] sm:$0x3]  ;;  %v202_v15 = vld [vmem:[%s950_s20 + $0x20] sm:$0xff] }
  0x13   : > { %v207_v7 = vld [vmem:[%s950_s20 + $0x48] sm:$0x3]  ;;  %v209_v8 = vld [vmem:[%s950_s20 + $0x58] sm:$0x3]  ;;  %v204_v16 = vld [vmem:[%s950_s20 + $0x30] sm:$0xff] }
  0x14   : > { %v211_v9 = vld [vmem:[%s950_s20 + $0x68] sm:$0x3]  ;;  %v213_v10 = vld [vmem:[%s950_s20 + $0x78] sm:$0x3]  ;;  %v206_v17 = vld [vmem:[%s950_s20 + $0x40] sm:$0xff] }
  0x15   : > { %v215_v11 = vld [vmem:[%s950_s20 + $0x88] sm:$0x3]  ;;  %v217_v12 = vld [vmem:[%s950_s20 + $0x98] sm:$0x3]  ;;  %v208_v18 = vld [vmem:[%s950_s20 + $0x50] sm:$0xff] }
  0x16   : > { %236 = vperm.xlu1 %892, %v961_v4   ;;  %357 = vperm.xlu0 %893, %v961_v4   ;;  %v199_v13 = vld [vmem:[%s950_s20 + $0x8] sm:$0x3]  ;;  %v210_v19 = vld [vmem:[%s950_s20 + $0x60] sm:$0xff]  ;;  %v212_v20 = vld [vmem:[%s950_s20 + $0x70] sm:$0xff] }
  0x17   : > { %v214_v21 = vld [vmem:[%s950_s20 + $0x80] sm:$0xff]  ;;  %v216_v22 = vld [vmem:[%s950_s20 + $0x90] sm:$0xff] }
  0x1a   : > { %246 = vperm.xlu1 %892, %v966_v5   ;;  %365 = vperm.xlu0 %893, %v966_v5  }
  0x1e   : > { %256 = vperm.xlu1 %892, %v205_v6   ;;  %373 = vperm.xlu0 %893, %v205_v6  }
  0x22   : > { %266 = vperm.xlu1 %892, %v207_v7   ;;  %381 = vperm.xlu0 %893, %v207_v7  }
  0x26   : > { %276 = vperm.xlu1 %892, %v209_v8   ;;  %389 = vperm.xlu0 %893, %v209_v8  }
  0x2a   : > { %286 = vperm.xlu1 %892, %v211_v9   ;;  %397 = vperm.xlu0 %893, %v211_v9  }
  0x2e   : > { %296 = vperm.xlu1 %892, %v213_v10   ;;  %405 = vperm.xlu0 %893, %v213_v10  }
  0x32   : > { %306 = vperm.xlu1 %892, %v215_v11   ;;  %413 = vperm.xlu0 %893, %v215_v11  }
  0x36   : > { %316 = vperm.xlu1 %892, %v217_v12   ;;  %421 = vperm.xlu0 %893, %v217_v12  }
  0x3a   : > { %894 = vset.pattern.permute.xlu1 %v907_v0  ;;  %896 = vset.pattern.permute.xlu0 %v909_v14 }
  0x3b   : > { %349 = vperm.xlu1 %894, %v199_v13   ;;  %474 = vperm.xlu0 %896, %v199_v13  }
  0x3f   : > { %353 = vperm.xlu1 %894, %v953_v2   ;;  %486 = vperm.xlu0 %896, %v202_v15  }
  0x43   : > { %361 = vperm.xlu1 %894, %v202_v15   ;;  %494 = vperm.xlu0 %896, %v204_v16  }
  0x47   : > { %369 = vperm.xlu1 %894, %v204_v16   ;;  %502 = vperm.xlu0 %896, %v206_v17  }
  0x4b   : > { %377 = vperm.xlu1 %894, %v206_v17   ;;  %510 = vperm.xlu0 %896, %v208_v18  }
  0x4f   : > { %385 = vperm.xlu1 %894, %v208_v18   ;;  %518 = vperm.xlu0 %896, %v210_v19  }
  0x53   : > { %393 = vperm.xlu1 %894, %v210_v19   ;;  %526 = vperm.xlu0 %896, %v212_v20  }
  0x57   : > { %401 = vperm.xlu1 %894, %v212_v20   ;;  %534 = vperm.xlu0 %896, %v214_v21  }
  0x5b   : > { %409 = vperm.xlu1 %894, %v214_v21   ;;  %542 = vperm.xlu0 %896, %v216_v22  }
  0x5f   : > { %417 = vperm.xlu1 %894, %v216_v22   ;;  %897 = vset.pattern.permute.xlu0 %v908_v1 }
  0x60   : > { %221 = vperm.xlu0 %897, %v956_v3  }
  0x63   : > { %895 = vset.pattern.permute.xlu1 %v909_v14 }
  0x64   : > { %470 = vperm.xlu1 %895, %v956_v3   ;;  %226 = vperm.xlu0 %897, %v199_v13  }
  0x68   : > { %478 = vperm.xlu1 %895, %v953_v2   ;;  %241 = vperm.xlu0 %897, %v202_v15  }
  0x6c   : > { %482 = vperm.xlu1 %895, %v961_v4   ;;  %251 = vperm.xlu0 %897, %v204_v16  }
  0x70   : > { %490 = vperm.xlu1 %895, %v966_v5   ;;  %261 = vperm.xlu0 %897, %v206_v17  }
  0x74   : > { %498 = vperm.xlu1 %895, %v205_v6   ;;  %271 = vperm.xlu0 %897, %v208_v18  }
  0x78   : > { %506 = vperm.xlu1 %895, %v207_v7   ;;  %281 = vperm.xlu0 %897, %v210_v19  }
  0x7c   : > { %514 = vperm.xlu1 %895, %v209_v8   ;;  %291 = vperm.xlu0 %897, %v212_v20  }
  0x80   : > { %522 = vperm.xlu1 %895, %v211_v9   ;;  %301 = vperm.xlu0 %897, %v214_v21  }
  0x84   : > { %530 = vperm.xlu1 %895, %v213_v10   ;;  %311 = vperm.xlu0 %897, %v216_v22  }
  0x88   : > { %538 = vperm.xlu1 %895, %v215_v11   ;;  %742 = vperm.xlu0 %897, %v731_v23  }
  0x8c   : > { %546 = vperm.xlu1 %895, %v217_v12   ;;  %757 = vperm.xlu0 %897, %v734_v24  }
  0x90   : > { %898 = vset.pattern.permute.xlu1 %v908_v1  ;;  %767 = vperm.xlu0 %897, %v736_v25  }
  0x91   : > { %v1006_v27 = vpop.permute.xlu1 %231  ;;  %747 = vperm.xlu1 %898, %v732_v26   ;;  %v1008_v28 = vpop.permute.xlu0 %345 }
  0x94   : > { %777 = vperm.xlu0 %897, %v738_v29  }
  0x95   : > { %v237_v33 = vpop.permute.xlu1 %236  ;;  %752 = vperm.xlu1 %898, %v733_v30   ;;  %v358_v34 = vpop.permute.xlu0 %357 }
  0x96   : > { %v326_v35 = vmul.f32 %v1024_v32, %v237_v33  ;;  %v431_v36 = vmul.f32 %v1019_v31, %v358_v34 }
  0x98   : > { %v1031_v38 = vadd.f32 %v431_v36, %v326_v35 }
  0x99   : > { %v247_v39 = vpop.permute.xlu1 %246  ;;  %762 = vperm.xlu1 %898, %v735_v37   ;;  %v366_v40 = vpop.permute.xlu0 %365 }
  0x9a   : > { %v328_v41 = vmul.f32 %v1024_v32, %v247_v39  ;;  %v433_v42 = vmul.f32 %v1019_v31, %v366_v40 }
  0x9c   : > { %v1038_v44 = vadd.f32 %v433_v42, %v328_v41 }
  0x9d   : > { %v257_v45 = vpop.permute.xlu1 %256  ;;  %772 = vperm.xlu1 %898, %v737_v43   ;;  %v374_v46 = vpop.permute.xlu0 %373 }
  0x9e   : > { %v330_v47 = vmul.f32 %v1024_v32, %v257_v45  ;;  %v435_v48 = vmul.f32 %v1019_v31, %v374_v46  ;;  %v325_v46 = vmul.f32 %v1024_v32, %v1006_v27 }
  0xa0   : > { %v1042_v49 = vadd.f32 %v435_v48, %v330_v47  ;;  %v1081_v47 = vld [vmem:[%s1216_s1 + $0x2] ss:$0 sm:$0xff]  ;;  %v428_v48 = vmul.f32 %v1019_v31, %v1008_v28 }
  0xa1   : > { %v267_v50 = vpop.permute.xlu1 %266  ;;  %v382_v51 = vpop.permute.xlu0 %381 }
  0xa2   : > { %v332_v52 = vmul.f32 %v1024_v32, %v267_v50  ;;  %v437_v53 = vmul.f32 %v1019_v31, %v382_v51 }
  0xa4   : > { %v1046_v54 = vadd.f32 %v437_v53, %v332_v52 }
  0xa5   : > { %v277_v55 = vpop.permute.xlu1 %276  ;;  %v390_v56 = vpop.permute.xlu0 %389 }
  0xa6   : > { %v334_v57 = vmul.f32 %v1024_v32, %v277_v55  ;;  %v439_v58 = vmul.f32 %v1019_v31, %v390_v56 }
  0xa8   : > { %v1050_v59 = vadd.f32 %v439_v58, %v334_v57 }
  0xa9   : > { %v287_v60 = vpop.permute.xlu1 %286  ;;  %v398_v61 = vpop.permute.xlu0 %397 }
  0xaa   : > { %v336_v62 = vmul.f32 %v1024_v32, %v287_v60  ;;  %v441_v63 = vmul.f32 %v1019_v31, %v398_v61 }
  0xac   : > { %v1054_v0 = vadd.f32 %v441_v63, %v336_v62 }
  0xad   : > { %v297_v1 = vpop.permute.xlu1 %296  ;;  %v406_v2 = vpop.permute.xlu0 %405 }
  0xae   : > { %v338_v3 = vmul.f32 %v1024_v32, %v297_v1  ;;  %v443_v4 = vmul.f32 %v1019_v31, %v406_v2 }
  0xb0   : > { %v1058_v5 = vadd.f32 %v443_v4, %v338_v3 }
  0xb1   : > { %v307_v6 = vpop.permute.xlu1 %306  ;;  %v414_v7 = vpop.permute.xlu0 %413 }
  0xb2   : > { %v340_v8 = vmul.f32 %v1024_v32, %v307_v6  ;;  %v445_v9 = vmul.f32 %v1019_v31, %v414_v7 }
  0xb4   : > { %v1062_v10 = vadd.f32 %v445_v9, %v340_v8 }
  0xb5   : > { %v317_v11 = vpop.permute.xlu1 %316  ;;  %v422_v12 = vpop.permute.xlu0 %421 }
  0xb6   : > { %v342_v13 = vmul.f32 %v1024_v32, %v317_v11  ;;  %v447_v14 = vmul.f32 %v1019_v31, %v422_v12 }
  0xb8   : > { %v1066_v15 = vadd.f32 %v447_v14, %v342_v13 }
  0xba   : > { %v350_v16 = vpop.permute.xlu1 %349  ;;  %v475_v17 = vpop.permute.xlu0 %474 }
  0xbb   : > { %v429_v60 = vmul.f32 %v1019_v31, %v350_v16  ;;  %v554_v11 = vmul.f32 %v1081_v47, %v475_v17 }
  0xbe   : > { %v354_v18 = vpop.permute.xlu1 %353  ;;  %v487_v19 = vpop.permute.xlu0 %486 }
  0xbf   : > { %v430_v41 = vmul.f32 %v1019_v31, %v354_v18  ;;  %v557_v28 = vmul.f32 %v1081_v47, %v487_v19 }
  0xc1   : > { %v450_v51 = vadd.f32 %v430_v41, %v325_v46 }
  0xc2   : > { %v362_v20 = vpop.permute.xlu1 %361  ;;  %v495_v21 = vpop.permute.xlu0 %494 }
  0xc3   : > { %v432_v52 = vmul.f32 %v1019_v31, %v362_v20  ;;  %v559_v13 = vmul.f32 %v1081_v47, %v495_v21 }
  0xc6   : > { %v370_v22 = vpop.permute.xlu1 %369  ;;  %v503_v23 = vpop.permute.xlu0 %502 }
  0xc7   : > { %v434_v8 = vmul.f32 %v1019_v31, %v370_v22  ;;  %v561_v22 = vmul.f32 %v1081_v47, %v503_v23 }
  0xca   : > { %v378_v24 = vpop.permute.xlu1 %377  ;;  %v511_v25 = vpop.permute.xlu0 %510 }
  0xcb   : > { %v436_v19 = vmul.f32 %v1019_v31, %v378_v24  ;;  %v563_v17 = vmul.f32 %v1081_v47, %v511_v25 }
  0xce   : > { %v386_v26 = vpop.permute.xlu1 %385  ;;  %v519_v29 = vpop.permute.xlu0 %518 }
  0xcf   : > { %v565_v21 = vmul.f32 %v1081_v47, %v519_v29 }
  0xd2   : > { %v394_v30 = vpop.permute.xlu1 %393  ;;  %v527_v33 = vpop.permute.xlu0 %526 }
  0xd3   : > { %v440_v24 = vmul.f32 %v1019_v31, %v394_v30 }
  0xd6   : > { %v402_v34 = vpop.permute.xlu1 %401  ;;  %v535_v35 = vpop.permute.xlu0 %534 }
  0xd7   : > { %v1112_v25 = vmul.f32 %v1081_v47, %v535_v35 }
  0xda   : > { %v1068_v36 = vpop.permute.xlu1 %409  ;;  %v1070_v37 = vpop.permute.xlu0 %542 }
  0xde   : > { %v1072_v39 = vpop.permute.xlu1 %417 }
  0xdf   : > { %v222_v40 = vpop.permute.xlu0 %221 }
  0xe0   : > { %v323_v45 = vmul.f32 %v1024_v32, %v222_v40 }
  0xe2   : > { %v448_v56 = vadd.f32 %v428_v48, %v323_v45  ;;  %v1108_v48 = vmul.f32 %v1081_v47, %v527_v33 }
  0xe3   : > { %v471_v42 = vpop.permute.xlu1 %470  ;;  %v227_v43 = vpop.permute.xlu0 %226 }
  0xe4   : > { %v553_v50 = vmul.f32 %v1081_v47, %v471_v42  ;;  %v324_v57 = vmul.f32 %v1024_v32, %v227_v43 }
  0xe6   : > { %v573_v61 = vadd.f32 %v553_v50, %v448_v56  ;;  %v449_v3 = vadd.f32 %v429_v60, %v324_v57  ;;  %v442_v50 = vmul.f32 %v1019_v31, %v402_v34 }
  0xe7   : > { %v479_v53 = vpop.permute.xlu1 %478  ;;  %v242_v55 = vpop.permute.xlu0 %241 }
  0xe8   : > { %v555_v27 = vmul.f32 %v1081_v47, %v479_v53  ;;  %v327_v58 = vmul.f32 %v1024_v32, %v242_v55  ;;  %v574_v20 = vadd.f32 %v554_v11, %v449_v3 }
  0xea   : > { %v575_v62 = vadd.f32 %v555_v27, %v450_v51  ;;  %v452_v63 = vadd.f32 %v432_v52, %v327_v58 }
  0xeb   : > { %v483_v1 = vpop.permute.xlu1 %482  ;;  %v252_v2 = vpop.permute.xlu0 %251 }
  0xec   : > { %v593_v4 = vadd.f32 %v575_v62, %v573_v61  ;;  %v556_v6 = vmul.f32 %v1081_v47, %v483_v1  ;;  %v329_v7 = vmul.f32 %v1024_v32, %v252_v2  ;;  %v577_v9 = vadd.f32 %v557_v28, %v452_v63 }
  0xee   : > { %v576_v12 = vadd.f32 %v556_v6, %v1031_v38  ;;  %v454_v14 = vadd.f32 %v434_v8, %v329_v7  ;;  %v438_v38 = vmul.f32 %v1019_v31, %v386_v26  ;;  %v609_v42 = vadd.f32 %v593_v4, %v577_v9 }
  0xef   : > { %v491_v16 = vpop.permute.xlu1 %490  ;;  %v262_v18 = vpop.permute.xlu0 %261  ;;  %v595_v55 = vadd.f32 %v577_v9, %v575_v62  ;;  %v1125_v8 = vmul.f32 %v1081_v47, %v1070_v37 }
  0xf0   : > { %v558_v40 = vmul.f32 %v1081_v47, %v491_v16  ;;  %v331_v41 = vmul.f32 %v1024_v32, %v262_v18  ;;  %v594_v43 = vadd.f32 %v576_v12, %v574_v20  ;;  %v579_v51 = vadd.f32 %v559_v13, %v454_v14 }
  0xf1   : > { %v642_v33 = vrot.slane %v609_v42, 1  ;;  %v683_v27 = vrot.slane %v609_v42, 2 }
  0xf2   : > { %v578_v45 = vadd.f32 %v558_v40, %v1038_v44  ;;  %v456_v46 = vadd.f32 %v436_v19, %v331_v41  ;;  %v444_v44 = vmul.f32 %v1019_v31, %v1068_v36  ;;  %v597_v58 = vadd.f32 %v579_v51, %v577_v9 }
  0xf3   : > { %v499_v23 = vpop.permute.xlu1 %498  ;;  %v272_v52 = vpop.permute.xlu0 %271  ;;  %v611_v60 = vadd.f32 %v595_v55, %v579_v51 }
  0xf4   : > { %v596_v26 = vadd.f32 %v578_v45, %v576_v12  ;;  %v610_v53 = vadd.f32 %v594_v43, %v578_v45  ;;  %v560_v29 = vmul.f32 %v1081_v47, %v499_v23  ;;  %v333_v30 = vmul.f32 %v1024_v32, %v272_v52 }
  0xf5   : > { %v581_v34 = vadd.f32 %v561_v22, %v456_v46  ;;  %v446_v12 = vmul.f32 %v1019_v31, %v1072_v39  ;;  %v645_v19 = vrot.slane %v611_v60, 1 }
  0xf6   : > { %v643_v56 = vrot.slane %v610_v53, 1  ;;  %v684_v57 = vrot.slane %v610_v53, 2  ;;  %v580_v35 = vadd.f32 %v560_v29, %v1042_v49  ;;  %v458_v61 = vadd.f32 %v438_v38, %v333_v30 }
  0xf7   : > { %v507_v63 = vpop.permute.xlu1 %506  ;;  %v282_v28 = vpop.permute.xlu0 %281  ;;  %v1127_v49 = vadd.f32 %v597_v58, %v581_v34  ;;  %v599_v13 = vadd.f32 %v581_v34, %v579_v51 }
  0xf8   : > { %v562_v1 = vmul.f32 %v1081_v47, %v507_v63  ;;  %v335_v2 = vmul.f32 %v1024_v32, %v282_v28  ;;  %v644_v36 = vsel %vm641_vm0, %v642_v33, %v643_v56  ;;  %v685_v62 = vsel %vm682_vm1, %v683_v27, %v684_v57 }
  0xf9   : > { %v598_v3 = vadd.f32 %v580_v35, %v578_v45  ;;  %v612_v4 = vadd.f32 %v596_v26, %v580_v35  ;;  %v583_v6 = vadd.f32 %v563_v17, %v458_v61  ;;  %v674_v7 = vadd.f32 %v644_v36, %v609_v42 }
  0xfa   : > { %v582_v9 = vadd.f32 %v562_v1, %v1046_v54  ;;  %v460_v11 = vadd.f32 %v440_v24, %v335_v2  ;;  %v686_v54 = vrot.slane %v611_v60, 2  ;;  %v648_v31 = vrot.slane %v1127_v49, 1 }
  0xfb   : > { %v646_v14 = vrot.slane %v612_v4, 1  ;;  %v515_v16 = vpop.permute.xlu1 %514  ;;  %v292_v18 = vpop.permute.xlu0 %291  ;;  %v687_v20 = vrot.slane %v612_v4, 2  ;;  %v615_v22 = vadd.f32 %v599_v13, %v583_v6  ;;  %v715_v38 = vadd.f32 %v685_v62, %v674_v7  ;;  %v1156_v62 = vld [vmem:[%s1217_s2] ss:$0 sm:$0xff] }
  0xfc   : > { %v600_v40 = vadd.f32 %v582_v9, %v580_v35  ;;  %v1132_v41 = vadd.f32 %v598_v3, %v582_v9  ;;  %v564_v37 = vmul.f32 %v1081_v47, %v515_v16  ;;  %v337_v17 = vmul.f32 %v1024_v32, %v292_v18 }
  0xfd   : > { %v601_v42 = vadd.f32 %v583_v6, %v581_v34  ;;  %v585_v43 = vadd.f32 %v565_v21, %v460_v11  ;;  %v689_v39 = vrot.slane %v1127_v49, 2  ;;  %v647_v52 = vsel %vm641_vm0, %v645_v19, %v646_v14 }
  0xfe   : > { %v649_v45 = vrot.slane %v1132_v41, 1  ;;  %v584_v46 = vadd.f32 %v564_v37, %v1050_v59  ;;  %v462_v24 = vadd.f32 %v442_v50, %v337_v17  ;;  %v675_v29 = vadd.f32 %v647_v52, %v611_v60 }
  0xff   : > { %v523_v51 = vpop.permute.xlu1 %522  ;;  %v302_v23 = vpop.permute.xlu0 %301  ;;  %v688_v21 = vsel %vm682_vm1, %v686_v54, %v687_v20  ;;  %v651_v56 = vrot.slane %v615_v22, 1  ;;  %v603_v57 = vadd.f32 %v585_v43, %v583_v6  ;;  %v692_v63 = vrot.slane %v615_v22, 2 }
 0x100   : > { %v566_v26 = vmul.f32 %v1081_v47, %v523_v51  ;;  %v339_v53 = vmul.f32 %v1024_v32, %v302_v23  ;;  %v602_v55 = vadd.f32 %v584_v46, %v582_v9  ;;  %v616_v30 = vadd.f32 %v600_v40, %v584_v46 }
 0x101   : > { %v587_v33 = vadd.f32 %v1108_v48, %v462_v24  ;;  %v716_v34 = vadd.f32 %v688_v21, %v675_v29  ;;  %v650_v60 = vsel %vm641_vm0, %v648_v31, %v649_v45  ;;  %v690_v36 = vrot.slane %v1132_v41, 2 }
 0x102   : > { %v586_v59 = vadd.f32 %v566_v26, %v1054_v0  ;;  %v464_v50 = vadd.f32 %v444_v44, %v339_v53  ;;  %v652_v27 = vrot.slane %v616_v30, 1  ;;  %v693_v58 = vrot.slane %v616_v30, 2 }
 0x103   : > { %v531_v35 = vpop.permute.xlu1 %530  ;;  %v312_v61 = vpop.permute.xlu0 %311  ;;  %v619_v28 = vadd.f32 %v603_v57, %v587_v33  ;;  %v1159_v4 = vadd.f32 %v601_v42, %v585_v43  ;;  %v605_v6 = vadd.f32 %v587_v33, %v585_v43  ;;  %v723_v7 = vmul.f32 0.11111111, %v715_v38 }
 0x104   : > { %v604_v1 = vadd.f32 %v586_v59, %v584_v46  ;;  %v1147_v2 = vadd.f32 %v602_v55, %v586_v59  ;;  %v568_v48 = vmul.f32 %v1081_v47, %v531_v35  ;;  %v589_v0 = vadd.f32 %v1112_v25, %v464_v50 }
 0x105   : > { %v341_v44 = vmul.f32 %v1024_v32, %v312_v61  ;;  %v653_v3 = vsel %vm641_vm0, %v651_v56, %v652_v27  ;;  %v676_v9 = vadd.f32 %v650_v60, %v1127_v49  ;;  %v694_v16 = vsel %vm682_vm1, %v692_v63, %v693_v58 }
 0x106   : > { %v588_v11 = vadd.f32 %v568_v48, %v1058_v5  ;;  %v677_v32 = vadd.f32 %v653_v3, %v615_v22  ;;  %v655_v18 = vrot.slane %v1147_v2, 1  ;;  %v657_v40 = vrot.slane %v619_v28, 1 }
 0x107   : > { %v466_v13 = vadd.f32 %v446_v12, %v341_v44  ;;  %v539_v25 = vpop.permute.xlu1 %538  ;;  %v743_v14 = vpop.permute.xlu0 %742  ;;  %v1168_v41 = vadd.f32 %v605_v6, %v589_v0  ;;  %v696_v12 = vrot.slane %v1147_v2, 2  ;;  %v607_v42 = vadd.f32 %v589_v0, %v587_v33 }
 0x108   : > { %v570_v19 = vmul.f32 %v1081_v47, %v539_v25  ;;  %v786_v20 = vmul.f32 %v1156_v62, %v743_v14  ;;  %v620_v37 = vadd.f32 %v604_v1, %v588_v11  ;;  %v606_v17 = vadd.f32 %v588_v11, %v586_v59 }
 0x109   : > { %v718_v5 = vadd.f32 %v694_v16, %v677_v32  ;;  %v591_v22 = vadd.f32 %v1125_v8, %v466_v13  ;;  %v660_v53 = vrot.slane %v1168_v41, 1  ;;  %v654_v29 = vrot.slane %v1159_v4, 1 }
 0x10a   : > { %v590_v38 = vadd.f32 %v570_v19, %v1062_v10  ;;  %v794_v54 = vadd.f32 %v786_v20, %v723_v7  ;;  %v658_v43 = vrot.slane %v620_v37, 1  ;;  %v699_v31 = vrot.slane %v620_v37, 2 }
 0x10b   : > { %v547_v45 = vpop.permute.xlu1 %546  ;;  %v726_v46 = vmul.f32 0.11111111, %v718_v5  ;;  %v758_v24 = vpop.permute.xlu0 %757  ;;  %v698_v10 = vrot.slane %v619_v28, 2  ;;  %v623_v21 = vadd.f32 %v607_v42, %v591_v22  ;;  %v724_v59 = vmul.f32 0.11111111, %v716_v34 }
 0x10c   : > { %v608_v51 = vadd.f32 %v590_v38, %v588_v11  ;;  %v622_v23 = vadd.f32 %v606_v17, %v590_v38  ;;  %802 = vst [vmem:[%s1173_s23] sm:$0xff] %v794_v54  ;;  %v572_v52 = vmul.f32 %v1081_v47, %v547_v45  ;;  %v789_v26 = vmul.f32 %v1156_v62, %v758_v24 }
 0x10d   : > { %v659_v8 = vsel %vm641_vm0, %v657_v40, %v658_v43  ;;  %v691_v47 = vsel %vm682_vm1, %v689_v39, %v690_v36  ;;  %v656_v50 = vsel %vm641_vm0, %v654_v29, %v655_v18  ;;  %v700_v58 = vsel %vm682_vm1, %v698_v10, %v699_v31 }
 0x10e   : > { %v661_v55 = vrot.slane %v622_v23, 1  ;;  %v592_v30 = vadd.f32 %v572_v52, %v1066_v15  ;;  %v797_v33 = vadd.f32 %v789_v26, %v726_v46  ;;  %v679_v56 = vadd.f32 %v659_v8, %v619_v28 }
 0x10f   : > { %v768_v57 = vpop.permute.xlu0 %767  ;;  %v717_v61 = vadd.f32 %v691_v47, %v676_v9  ;;  %v678_v63 = vadd.f32 %v656_v50, %v1159_v4  ;;  %v695_v49 = vrot.slane %v1159_v4, 2  ;;  %v663_v34 = vrot.slane %v623_v21, 1 }
 0x110   : > { %v624_v27 = vadd.f32 %v608_v51, %v592_v30  ;;  %805 = vst [vmem:[%s1173_s23 + $0x18] sm:$0xff] %v797_v33  ;;  %v748_v35 = vpop.permute.xlu1 %747  ;;  %v720_v60 = vadd.f32 %v700_v58, %v679_v56  ;;  %v791_v15 = vmul.f32 %v1156_v62, %v768_v57  ;;  %v662_v2 = vsel %vm641_vm0, %v660_v53, %v661_v55 }
 0x111   : > { %v787_v28 = vmul.f32 %v1156_v62, %v748_v35  ;;  %v704_v0 = vrot.slane %v623_v21, 2  ;;  %v697_v44 = vsel %vm682_vm1, %v695_v49, %v696_v12  ;;  %v702_v3 = vrot.slane %v622_v23, 2 }
 0x112   : > { %v664_v39 = vrot.slane %v624_v27, 1  ;;  %v705_v1 = vrot.slane %v624_v27, 2  ;;  %v728_v48 = vmul.f32 0.11111111, %v720_v60  ;;  %v725_v9 = vmul.f32 0.11111111, %v717_v61 }
 0x113   : > { %v795_v36 = vadd.f32 %v787_v28, %v724_v59  ;;  %v719_v11 = vadd.f32 %v697_v44, %v678_v63  ;;  %v778_v25 = vpop.permute.xlu0 %777  ;;  %v680_v32 = vadd.f32 %v662_v2, %v1168_v41  ;;  %v701_v18 = vrot.slane %v1168_v41, 2 }
 0x114   : > { %v665_v6 = vsel %vm641_vm0, %v663_v34, %v664_v39  ;;  %v753_v7 = vpop.permute.xlu1 %752  ;;  %v799_v13 = vadd.f32 %v791_v15, %v728_v48  ;;  %v706_v16 = vsel %vm682_vm1, %v704_v0, %v705_v1  ;;  %v793_v40 = vmul.f32 %v1156_v62, %v778_v25 }
 0x115   : > { %803 = vst [vmem:[%s1173_s23 + $0x8] sm:$0xff] %v795_v36  ;;  %v681_v4 = vadd.f32 %v665_v6, %v623_v21  ;;  %v788_v14 = vmul.f32 %v1156_v62, %v753_v7  ;;  %v703_v17 = vsel %vm682_vm1, %v701_v18, %v702_v3  ;;  %v727_v12 = vmul.f32 0.11111111, %v719_v11 }
 0x116   : > { %807 = vst [vmem:[%s1173_s23 + $0x28] sm:$0xff] %v799_v13  ;;  %v721_v38 = vadd.f32 %v703_v17, %v680_v32 }
 0x117   : > { %v722_v19 = vadd.f32 %v706_v16, %v681_v4  ;;  %v796_v20 = vadd.f32 %v788_v14, %v725_v9 }
 0x118   : > { %v763_v37 = vpop.permute.xlu1 %762  ;;  %v729_v41 = vmul.f32 0.11111111, %v721_v38 }
 0x119   : > { %v730_v5 = vmul.f32 0.11111111, %v722_v19  ;;  %804 = vst [vmem:[%s1173_s23 + $0x10] sm:$0xff] %v796_v20  ;;  %v790_v22 = vmul.f32 %v1156_v62, %v763_v37 }
 0x11b   : > { %v801_v54 = vadd.f32 %v793_v40, %v730_v5  ;;  %v798_v42 = vadd.f32 %v790_v22, %v727_v12 }
 0x11c   : > { %v773_v43 = vpop.permute.xlu1 %772 }
 0x11d   : > { %809 = vst [vmem:[%s1173_s23 + $0x38] sm:$0xff] %v801_v54  ;;  %806 = vst [vmem:[%s1173_s23 + $0x20] sm:$0xff] %v798_v42  ;;  %v792_v31 = vmul.f32 %v1156_v62, %v773_v43 }
 0x11f   : > { %v800_v45 = vadd.f32 %v792_v31, %v729_v41 }
 0x121   : > { %808 = vst [vmem:[%s1173_s23 + $0x30] sm:$0xff] %v800_v45 }
 0x122 PF: > { %s14_s15 = sadd.s32 1, %s905_s15  }
 0x123   : > { %p11_p4 = scmp.ge.s32.totalorder %s14_s15, 4  }
 0x125   :  { %13 = sbr.rel (!%p11_p4) target bundleno = 1 (0x1), region = 66 }

// kernel: squeeze.5
= control target key start
LH: loop header
LB: loop body
LE: loop exit
PB: predicated region body
PF: predicated region fallthrough
CT: control target
= control target key end

     0   :  { %vm7_vm0 = vcmask 523264   ;;  %s39_s0 = inlined_call_operand.vmem [shape: s32[128], index: 0, kind: input, shape index: {}]   ;;  %s40_s1 = inlined_call_operand.vmem [shape: s32[2,64], index: 1, kind: output, shape index: {}]  }
   0x1   :  { %v4_v0 = vld [vmem:[%s39_s0] sm:$0x1]  ;;  %s22_s0 = smov 64  }
   0x2   :  { %5 = vst [vmem:[#allocation1] sm:$0x1] %v4_v0 }
   0x9   :  { %v9_v1 = vld [vmem:[#allocation1] sm:$0x1]  }
   0xa   :  { %v6_v2 = vld [vmem:[#allocation1] sm:$0x1]   ;;  %10 = vrot.lane.b32.xlu0 %v9_v1, %s22_s0 }
   0xb   :  { %8 = vst.msk [vmem:[#allocation0] sm:$0x1] %vm7_vm0, %v6_v2  }
  0x7c   :  { %v11_v3 = vpop.permute.xlu0 %10  }
  0x7d   :  { %14 = vst.msk [vmem:[#allocation0 + $0x1] sm:$0x1] %vm7_vm0, %v11_v3  }
  0x84   :  { %v18_v4 = vld [vmem:[#allocation0] sm:$0x3] }
  0x85   :  { %20 = vst [vmem:[%s40_s1] sm:$0x3] %v18_v4 }

// kernel: squeeze.4
= control target key start
LH: loop header
LB: loop body
LE: loop exit
PB: predicated region body
PF: predicated region fallthrough
CT: control target
= control target key end

     0   :  { %vm7_vm0 = vcmask 523264   ;;  %s39_s0 = inlined_call_operand.vmem [shape: f32[128], index: 0, kind: input, shape index: {}]   ;;  %s40_s1 = inlined_call_operand.vmem [shape: f32[2,64], index: 1, kind: output, shape index: {}]  }
   0x1   :  { %v4_v0 = vld [vmem:[%s39_s0] sm:$0x1]  ;;  %s22_s0 = smov 64  }
   0x2   :  { %5 = vst [vmem:[#allocation1] sm:$0x1] %v4_v0 }
   0x9   :  { %v9_v1 = vld [vmem:[#allocation1] sm:$0x1]  }
   0xa   :  { %v6_v2 = vld [vmem:[#allocation1] sm:$0x1]   ;;  %10 = vrot.lane.b32.xlu0 %v9_v1, %s22_s0 }
   0xb   :  { %8 = vst.msk [vmem:[#allocation0] sm:$0x1] %vm7_vm0, %v6_v2  }
  0x7c   :  { %v11_v3 = vpop.permute.xlu0 %10  }
  0x7d   :  { %14 = vst.msk [vmem:[#allocation0 + $0x1] sm:$0x1] %vm7_vm0, %v11_v3  }
  0x84   :  { %v18_v4 = vld [vmem:[#allocation0] sm:$0x3] }
  0x85   :  { %20 = vst [vmem:[%s40_s1] sm:$0x3] %v18_v4 }

// kernel: neg.1
= control target key start
LH: loop header
LB: loop body
LE: loop exit
PB: predicated region body
PF: predicated region fallthrough
CT: control target
= control target key end

     0   :  { %s40_s0 = inlined_call_operand.vmem [shape: f32[2,256], index: 0, kind: input, shape index: {}]   ;;  %s41_s1 = inlined_call_operand.vmem [shape: f32[2,256], index: 1, kind: output, shape index: {}]  }
   0x1   :  { %v2_v0 = vld [vmem:[%s40_s0] sm:$0x3]  ;;  %v16_v1 = vld [vmem:[%s40_s0 + $0x2] sm:$0x3] }
   0x2   :  { %v5_v2 = vxor.u32 2147483648, %v2_v0  ;;  %v12_v3 = vxor.u32 2147483648, %v16_v1 }
   0x4   :  { %7 = vst [vmem:[%s41_s1] sm:$0x3] %v5_v2  ;;  %17 = vst [vmem:[%s41_s1 + $0x2] sm:$0x3] %v12_v3 }

// kernel: classifier_patchcore_forward.7
= control target key start
LH: loop header
LB: loop body
LE: loop exit
PB: predicated region body
PF: predicated region fallthrough
CT: control target
= control target key end

     0   :  { %s1362_s18 = smov 0   ;;  %s1364_s19 = smov 0   ;;  %s2067_s0 = inlined_call_operand.vmem [shape: bf16[128,128], index: 0, kind: input, shape index: {}]   ;;  %s2068_s1 = inlined_call_operand.vmem [shape: bf16[256,128], index: 1, kind: input, shape index: {}]   ;;  %s2069_s2 = inlined_call_operand.vmem [shape: f32[128,1], index: 2, kind: input, shape index: {}]   ;;  %s2070_s3 = inlined_call_operand.vmem [shape: f32[1,256], index: 3, kind: input, shape index: {}]   ;;  %s2071_s4 = inlined_call_operand.vmem [shape: f32[128,1], index: 4, kind: output, shape index: {0}]   ;;  %s2072_s5 = inlined_call_operand.vmem [shape: s32[128,1], index: 5, kind: output, shape index: {1}]  }
   0x1   :  { %s1366_s20 = smov 0  }
   0x2 LB: > { %s28_s21 = sadd.s32 1, %s1324_s19  ;;  %p1171_p0 = scmp.ge.s32.totalorder %s1328_s20, 1  ;;  %s1328_s20 = sphi %s1366_s20, %s16_s20   ;;  %s1324_s19 = sphi %s1364_s19, %s2102_s19   ;;  %s1320_s18 = sphi %s1362_s18, %s2101_s18  }
   0x3   : > { %p30_p1 = scmp.ge.s32.totalorder %s28_s21, 2  ;;  %p235_p2 = scmp.lt.s32.totalorder %s1328_s20, 3 }
   0x5   : > { %s2104_s21 = smov (%p30_p1, %s28_s21), 0  ;;  %p236_p3 = pnand %p1171_p0, %p235_p2 }
   0x6   : > { %v1270_v0 = vld [vmem:[%s2068_s1 + $0x40] sm:$0xff] (!%p236_p3)   ;;  %s1172_s24 = sshll.u32 (!%p236_p3), %s1320_s18, 3  ;;  %v1272_v2 = vld [vmem:[%s2068_s1 + $0x48] sm:$0xff] (!%p236_p3)   ;;  %v1330_v3 = vmov (!%p236_p3), 0   ;;  %v1274_v5 = vld [vmem:[%s2068_s1 + $0x50] sm:$0xff] (!%p236_p3)   ;;  %vm322_vm0 = vcmask (!%p236_p3), 7168   ;;  %v654_v31 = vlaneseq (!%p236_p3) }
   0x7   : > { %239 = sbr.rel (%p236_p3) target bundleno = 762 (0x2fa), region = 36  ;;  %v1271_v1 = vld [vmem:[%s2068_s1] sm:$0xff] (!%p236_p3)   ;;  %p283_p4 = scmp.lt.s32.totalorder (!%p236_p3), %s1172_s24, 15  ;;  %1202 = vmatprep.subr.bf16.mxu0 (!%p236_p3), %v1270_v0  ;;  %1226 = vmatprep.subr.bf16.mxu1 (!%p236_p3), %v1270_v0  ;;  %v1273_v4 = vld [vmem:[%s2068_s1 + $0x8] sm:$0xff] (!%p236_p3)   ;;  %v1275_v6 = vld [vmem:[%s2068_s1 + $0x10] sm:$0xff] (!%p236_p3)   ;;  %v1331_v29 = vmov (!%p236_p3), inf  }
   0x8   : > { %1203 = vmatpush3.bf16.xpose.msra.mxu0 (!%p236_p3), %v1271_v1  ;;  %1234 = vmatpush3.bf16.xpose.msra.mxu1 (!%p236_p3), %v1271_v1  ;;  %v1276_v7 = vld [vmem:[%s2068_s1 + $0x58] sm:$0xff] (!%p236_p3)   ;;  %v1278_v15 = vld [vmem:[%s2068_s1 + $0x60] sm:$0xff] (!%p236_p3)   ;;  %v1280_v21 = vld [vmem:[%s2068_s1 + $0x68] sm:$0xff] (!%p236_p3)   ;;  %v655_v34 = vshrl.u32 (!%p236_p3), %v654_v31, 7 }
   0x9   : > { %1204 = vmatprep.subr.bf16.mxu0 (!%p236_p3), %v1272_v2  ;;  %1227 = vmatprep.subr.bf16.mxu1 (!%p236_p3), %v1272_v2  ;;  %v1277_v13 = vld [vmem:[%s2068_s1 + $0x18] sm:$0xff] (!%p236_p3)   ;;  %v1279_v19 = vld [vmem:[%s2068_s1 + $0x20] sm:$0xff] (!%p236_p3)   ;;  %v1281_v22 = vld [vmem:[%s2068_s1 + $0x28] sm:$0xff] (!%p236_p3)  }
   0xa   : > { %1268 = vset.pattern.permute.xlu0 (!%p236_p3), %v1330_v3  ;;  %1269 = vset.pattern.permute.xlu1 (!%p236_p3), %v1330_v3  ;;  %v1282_v23 = vld [vmem:[%s2068_s1 + $0x70] sm:$0xff] (!%p236_p3)   ;;  %v1284_v25 = vld [vmem:[%s2068_s1 + $0x78] sm:$0xff] (!%p236_p3)   ;;  %v656_v35 = vsub.s32 (!%p236_p3), 0, %v655_v34  ;;  %v652_v37 = vld [vmem:[%s2070_s3] sm:$0x3] (!%p236_p3)  ;;  %v660_v38 = vsub.s32 (!%p236_p3), 1, %v655_v34 }
   0xb   : > { %v1283_v24 = vld [vmem:[%s2068_s1 + $0x30] sm:$0xff] (!%p236_p3)   ;;  %v1285_v26 = vld [vmem:[%s2068_s1 + $0x38] sm:$0xff] (!%p236_p3)  }
   0xc   : > { %v1505_v46 = vrot.slane (!%p236_p3), %v652_v37, %v656_v35  ;;  %v1507_v51 = vrot.slane (!%p236_p3), %v652_v37, %v660_v38 }
   0xe   : > { %s2106_s24 = smov (!%p283_p4, %s1172_s24), 15 }
   0xf   : > { %s1173_s8 = sshll.u32 %s2106_s24, 2  ;;  %s1405_s14 = sshll.u32 %s2106_s24, 3 }
  0x10   : > { %1205 = vmatpush3.bf16.xpose.msra.mxu0 %v1273_v4  ;;  %1235 = vmatpush3.bf16.xpose.msra.mxu1 %v1273_v4  ;;  %s1400_s11 = scalar_lea.vmem %s2067_s0, %s1173_s8  ;;  %s298_s22 = scalar_lea.vmem %s2069_s2, %s1405_s14 }
  0x11   : > { %1206 = vmatprep.subr.bf16.mxu0 %v1274_v5  ;;  %1228 = vmatprep.subr.bf16.mxu1 %v1274_v5  ;;  %v1286_v8 = vld [vmem:[%s1400_s11] sm:$0xff]   ;;  %v1287_v9 = vld [vmem:[%s1400_s11 + $0x10] sm:$0xff]   ;;  %v573_v12 = vld [vmem:[%s298_s22 + $0x8] sm:$0xff]  ;;  %s1449_s23 = scalar_lea.vmem %s2071_s4, %s1405_s14 }
  0x12   : > { %1218 = vmatprep.mubr.bf16.mxu0 %v1286_v8  ;;  %v572_v10 = vld [vmem:[%s298_s22] sm:$0xff]  ;;  %v574_v11 = vld [vmem:[%s298_s22 + $0x10] sm:$0xff]  ;;  %1222 = vmatprep.mubr.bf16.mxu1 %v1287_v9  ;;  %v575_v14 = vld [vmem:[%s298_s22 + $0x18] sm:$0xff]  ;;  %327 = vst.msk [vmem:[%s1449_s23 + $0x20] sm:$0xff] %vm322_vm0, %v1331_v29 }
  0x13   : > { %598 = vperm.xlu0 %1268, %v572_v10   ;;  %608 = vperm.xlu1 %1269, %v574_v11   ;;  %v576_v16 = vld [vmem:[%s298_s22 + $0x20] sm:$0xff]  ;;  %v577_v17 = vld [vmem:[%s298_s22 + $0x28] sm:$0xff]  ;;  %v578_v18 = vld [vmem:[%s298_s22 + $0x30] sm:$0xff]  ;;  %323 = vst.msk [vmem:[%s1449_s23] sm:$0xff] %vm322_vm0, %v1331_v29 }
  0x14   : > { %v579_v20 = vld [vmem:[%s298_s22 + $0x38] sm:$0xff]  ;;  %v1288_v27 = vld [vmem:[%s1400_s11 + $0x8] sm:$0xff]   ;;  %324 = vst.msk [vmem:[%s1449_s23 + $0x8] sm:$0xff] %vm322_vm0, %v1331_v29  ;;  %325 = vst.msk [vmem:[%s1449_s23 + $0x10] sm:$0xff] %vm322_vm0, %v1331_v29 }
  0x15   : > { %v1289_v28 = vld [vmem:[%s1400_s11 + $0x18] sm:$0xff]   ;;  %s1455_s11 = scalar_lea.vmem %s2072_s5, %s1405_s14  ;;  %326 = vst.msk [vmem:[%s1449_s23 + $0x18] sm:$0xff] %vm322_vm0, %v1331_v29  ;;  %328 = vst.msk [vmem:[%s1449_s23 + $0x28] sm:$0xff] %vm322_vm0, %v1331_v29 }
  0x16   : > { %329 = vst.msk [vmem:[%s1449_s23 + $0x30] sm:$0xff] %vm322_vm0, %v1331_v29  ;;  %330 = vst.msk [vmem:[%s1449_s23 + $0x38] sm:$0xff] %vm322_vm0, %v1331_v29 }
  0x17   : > { %603 = vperm.xlu0 %1268, %v573_v12   ;;  %613 = vperm.xlu1 %1269, %v575_v14   ;;  %331 = vst.msk [vmem:[%s1455_s11] sm:$0xff] %vm322_vm0, %v1330_v3  ;;  %332 = vst.msk [vmem:[%s1455_s11 + $0x8] sm:$0xff] %vm322_vm0, %v1330_v3 }
  0x18   : > { %1207 = vmatpush3.bf16.xpose.msra.mxu0 %v1275_v6  ;;  %1236 = vmatpush3.bf16.xpose.msra.mxu1 %v1275_v6  ;;  %333 = vst.msk [vmem:[%s1455_s11 + $0x10] sm:$0xff] %vm322_vm0, %v1330_v3  ;;  %334 = vst.msk [vmem:[%s1455_s11 + $0x18] sm:$0xff] %vm322_vm0, %v1330_v3 }
  0x19   : > { %1208 = vmatprep.subr.bf16.mxu0 %v1276_v7  ;;  %1229 = vmatprep.subr.bf16.mxu1 %v1276_v7  ;;  %335 = vst.msk [vmem:[%s1455_s11 + $0x20] sm:$0xff] %vm322_vm0, %v1330_v3  ;;  %336 = vst.msk [vmem:[%s1455_s11 + $0x28] sm:$0xff] %vm322_vm0, %v1330_v3 }
  0x1a   : > { %337 = vst.msk [vmem:[%s1455_s11 + $0x30] sm:$0xff] %vm322_vm0, %v1330_v3  ;;  %338 = vst.msk [vmem:[%s1455_s11 + $0x38] sm:$0xff] %vm322_vm0, %v1330_v3 }
  0x1b   : > { %618 = vperm.xlu0 %1268, %v576_v16   ;;  %623 = vperm.xlu1 %1269, %v577_v17  }
  0x1f   : > { %628 = vperm.xlu0 %1268, %v578_v18   ;;  %633 = vperm.xlu1 %1269, %v579_v20  }
  0x20   : > { %1209 = vmatpush3.bf16.xpose.msra.mxu0 %v1277_v13  ;;  %1237 = vmatpush3.bf16.xpose.msra.mxu1 %v1277_v13 }
  0x21   : > { %1210 = vmatprep.subr.bf16.mxu0 %v1278_v15  ;;  %1230 = vmatprep.subr.bf16.mxu1 %v1278_v15 }
  0x28   : > { %1211 = vmatpush3.bf16.xpose.msra.mxu0 %v1279_v19  ;;  %1238 = vmatpush3.bf16.xpose.msra.mxu1 %v1279_v19 }
  0x29   : > { %1212 = vmatprep.subr.bf16.mxu0 %v1280_v21  ;;  %1231 = vmatprep.subr.bf16.mxu1 %v1280_v21 }
  0x30   : > { %1213 = vmatpush3.bf16.xpose.msra.mxu0 %v1281_v22  ;;  %1239 = vmatpush3.bf16.xpose.msra.mxu1 %v1281_v22 }
  0x31   : > { %1214 = vmatprep.subr.bf16.mxu0 %v1282_v23  ;;  %1232 = vmatprep.subr.bf16.mxu1 %v1282_v23 }
  0x38   : > { %1215 = vmatpush3.bf16.xpose.msra.mxu0 %v1283_v24  ;;  %1240 = vmatpush3.bf16.xpose.msra.mxu1 %v1283_v24 }
  0x39   : > { %1216 = vmatprep.subr.bf16.mxu0 %v1284_v25  ;;  %1233 = vmatprep.subr.bf16.mxu1 %v1284_v25 }
  0x40   : > { %1217 = vmatpush3.bf16.xpose.msra.mxu0 %v1285_v26  ;;  %1241 = vmatpush3.bf16.xpose.msra.mxu1 %v1285_v26 }
  0x47   : > { %1219 = vmatmul.mubr.bf16.vlgmr.msra.gmra.mrb[0].mxu0 %v1286_v8  ;;  %1223 = vmatmul.mubr.bf16.vlgmr.msra.gmra.mrb[0].mxu1 %v1287_v9 }
  0x48   : > { %1220 = vmatprep.mubr.bf16.mxu0 %v1288_v27  ;;  %1224 = vmatprep.mubr.bf16.mxu1 %v1289_v28 }
  0x4f   : > { %1221 = vmatmul.mubr.bf16.gmra.mrb[4].mxu0 %v1288_v27  ;;  %1225 = vmatmul.mubr.bf16.gmra.mrb[4].mxu1 %v1289_v28 }
  0x92   : > { %v599_v30 = vpop.permute.xlu0 %598  ;;  %v1497_v32 = vpop.permute.xlu1 %608 }
  0x96   : > { %v604_v33 = vpop.permute.xlu0 %603  ;;  %v1500_v36 = vpop.permute.xlu1 %613 }
  0x9a   : > { %v619_v39 = vpop.permute.xlu0 %618  ;;  %v624_v58 = vpop.permute.xlu1 %623 }
  0x9e   : > { %v629_v7 = vpop.permute.xlu0 %628 }
 0x11a   : > { %v533_v40 = vpop.f32.mrb[0].mxu0  ;;  %v553_v41 = vpop.f32.mrb[0].mxu1 }
 0x11b   : > { %v580_v42 = vmul.f32 2.0, %v533_v40  ;;  %v588_v43 = vmul.f32 2.0, %v553_v41  ;;  %v535_v44 = vpop.f32.mrb[1].mxu0  ;;  %v555_v45 = vpop.f32.mrb[1].mxu1 }
 0x11c   : > { %v581_v47 = vmul.f32 2.0, %v535_v44  ;;  %v589_v48 = vmul.f32 2.0, %v555_v45  ;;  %v537_v49 = vpop.f32.mrb[2].mxu0  ;;  %v557_v50 = vpop.f32.mrb[2].mxu1 }
 0x11d   : > { %v636_v52 = vsub.f32 %v599_v30, %v580_v42  ;;  %v644_v53 = vsub.f32 %v619_v39, %v588_v43  ;;  %v582_v54 = vmul.f32 2.0, %v537_v49  ;;  %v590_v55 = vmul.f32 2.0, %v557_v50  ;;  %v539_v56 = vpop.f32.mrb[3].mxu0  ;;  %v559_v57 = vpop.f32.mrb[3].mxu1 }
 0x11e   : > { %v637_v59 = vsub.f32 %v599_v30, %v581_v47  ;;  %v645_v60 = vsub.f32 %v619_v39, %v589_v48  ;;  %v583_v61 = vmul.f32 2.0, %v539_v56  ;;  %v591_v62 = vmul.f32 2.0, %v559_v57  ;;  %v634_v39 = vpop.permute.xlu1 %633 }
 0x11f   : > { %v638_v63 = vsub.f32 %v604_v33, %v582_v54  ;;  %v646_v0 = vsub.f32 %v624_v58, %v590_v55  ;;  %v1510_v1 = vadd.f32 %v1505_v46, %v644_v53  ;;  %v1513_v2 = vadd.f32 %v1505_v46, %v636_v52 }
 0x120   : > { %v639_v3 = vsub.f32 %v604_v33, %v583_v61  ;;  %v647_v4 = vsub.f32 %v624_v58, %v591_v62  ;;  %v1516_v5 = vadd.f32 %v1507_v51, %v645_v60  ;;  %v1519_v6 = vadd.f32 %v1507_v51, %v637_v59 }
 0x121   : > { %v688_v8 = vmax.f32 %v1510_v1, 0.0  ;;  %v680_v9 = vmax.f32 %v1513_v2, 0.0  ;;  %v1524_v10 = vadd.f32 %v1505_v46, %v646_v0  ;;  %v1527_v11 = vadd.f32 %v1505_v46, %v638_v63 }
 0x122   : > { %v543_v12 = vpop.f32.mrb[4].mxu0  ;;  %v563_v13 = vpop.f32.mrb[4].mxu1  ;;  %v689_v14 = vmax.f32 %v1516_v5, 0.0  ;;  %v681_v15 = vmax.f32 %v1519_v6, 0.0  ;;  %v1532_v16 = vadd.f32 %v1507_v51, %v647_v4  ;;  %v1535_v17 = vadd.f32 %v1507_v51, %v639_v3  ;;  %v1655_v5 = vld [vmem:[%s1449_s23 + $0x28] sm:$0xff] }
 0x123   : > { %v584_v18 = vmul.f32 2.0, %v543_v12  ;;  %v592_v19 = vmul.f32 2.0, %v563_v13  ;;  %v545_v20 = vpop.f32.mrb[5].mxu0  ;;  %v565_v21 = vpop.f32.mrb[5].mxu1  ;;  %v690_v22 = vmax.f32 %v1524_v10, 0.0  ;;  %v682_v23 = vmax.f32 %v1527_v11, 0.0 }
 0x124   : > { %v585_v24 = vmul.f32 2.0, %v545_v20  ;;  %v593_v25 = vmul.f32 2.0, %v565_v21  ;;  %v547_v26 = vpop.f32.mrb[6].mxu0  ;;  %v567_v27 = vpop.f32.mrb[6].mxu1  ;;  %v708_v28 = vmin.f32 %v688_v8, %v689_v14  ;;  %v696_v29 = vmin.f32 %v680_v9, %v681_v15  ;;  %v1616_v20 = vld [vmem:[%s1449_s23] sm:$0xff]  ;;  %v1689_v11 = vld [vmem:[%s1449_s23 + $0x30] sm:$0xff] }
 0x125   : > { %v640_v30 = vsub.f32 %v1497_v32, %v584_v18  ;;  %v648_v33 = vsub.f32 %v629_v7, %v592_v19  ;;  %v586_v34 = vmul.f32 2.0, %v547_v26  ;;  %v594_v35 = vmul.f32 2.0, %v567_v27  ;;  %v549_v37 = vpop.f32.mrb[7].mxu0  ;;  %v569_v38 = vpop.f32.mrb[7].mxu1  ;;  %v1613_v19 = vld [vmem:[%s1449_s23 + $0x20] sm:$0xff] }
 0x126   : > { %v641_v40 = vsub.f32 %v1497_v32, %v585_v24  ;;  %v649_v41 = vsub.f32 %v629_v7, %v593_v25  ;;  %v587_v42 = vmul.f32 2.0, %v549_v37  ;;  %v595_v43 = vmul.f32 2.0, %v569_v38  ;;  %709 = vmin.xlane.f32.xlu1 %v708_v28  ;;  %697 = vmin.xlane.f32.xlu0 %v696_v29 }
 0x127   : > { %v642_v44 = vsub.f32 %v1500_v36, %v586_v34  ;;  %v650_v45 = vsub.f32 %v634_v39, %v594_v35  ;;  %v691_v47 = vmax.f32 %v1532_v16, 0.0  ;;  %v683_v48 = vmax.f32 %v1535_v17, 0.0 }
 0x128   : > { %v643_v49 = vsub.f32 %v1500_v36, %v587_v42  ;;  %v651_v50 = vsub.f32 %v634_v39, %v595_v43  ;;  %v1554_v52 = vadd.f32 %v1505_v46, %v648_v33  ;;  %v1557_v32 = vadd.f32 %v1507_v51, %v649_v41  ;;  %v1731_v43 = vld [vmem:[%s1449_s23 + $0x18] sm:$0xff] }
 0x129   : > { %v711_v53 = vmin.f32 %v690_v22, %v691_v47  ;;  %v699_v54 = vmin.f32 %v682_v23, %v683_v48  ;;  %v1568_v55 = vadd.f32 %v1505_v46, %v640_v30  ;;  %v1571_v36 = vadd.f32 %v1507_v51, %v641_v40  ;;  %v1716_v40 = vld [vmem:[%s1449_s23 + $0x10] sm:$0xff] }
 0x12a   : > { %v1574_v56 = vadd.f32 %v1507_v51, %v643_v49  ;;  %v692_v57 = vmax.f32 %v1554_v52, 0.0  ;;  %v693_v58 = vmax.f32 %v1557_v32, 0.0  ;;  %v1581_v61 = vadd.f32 %v1505_v46, %v642_v44 }
 0x12b   : > { %712 = vmin.xlane.f32.xlu0 %v711_v53  ;;  %700 = vmin.xlane.f32.xlu1 %v699_v54  ;;  %v684_v59 = vmax.f32 %v1568_v55, 0.0  ;;  %v685_v60 = vmax.f32 %v1571_v36, 0.0  ;;  %v1584_v62 = vadd.f32 %v1507_v51, %v651_v50  ;;  %v1597_v7 = vadd.f32 %v1505_v46, %v650_v45  ;;  %v1789_v54 = vld [vmem:[%s1449_s23 + $0x38] sm:$0xff] }
 0x12c   : > { %v714_v63 = vmin.f32 %v692_v57, %v693_v58  ;;  %v686_v3 = vmax.f32 %v1581_v61, 0.0  ;;  %v687_v4 = vmax.f32 %v1574_v56, 0.0  ;;  %v1610_v46 = vand.u32 127, %v654_v31 }
 0x12d   : > { %v702_v0 = vmin.f32 %v684_v59, %v685_v60  ;;  %v694_v12 = vmax.f32 %v1597_v7, 0.0  ;;  %v695_v13 = vmax.f32 %v1584_v62, 0.0 }
 0x12e   : > { %v705_v51 = vmin.f32 %v686_v3, %v687_v4  ;;  %v1619_v21 = vadd.s32 128, %v1610_v46 }
 0x12f   : > { %715 = vmin.xlane.f32.xlu1 %v714_v63  ;;  %703 = vmin.xlane.f32.xlu0 %v702_v0  ;;  %v717_v18 = vmin.f32 %v694_v12, %v695_v13 }
 0x133   : > { %706 = vmin.xlane.f32.xlu0 %v705_v51 }
 0x137   : > { %718 = vmin.xlane.f32.xlu0 %v717_v18 }
 0x1b3   : > { %v1621_v24 = vpop.xlane.xlu1 %709  ;;  %v1623_v25 = vpop.xlane.xlu0 %697 }
 0x1b4   : > { %vm735_vm1 = vcmp.le.f32.partialorder %v688_v8, %v1621_v24  ;;  %vm736_vm2 = vcmp.le.f32.partialorder %v689_v14, %v1621_v24  ;;  %vm899_vm3 = vcmp.lt.f32.partialorder %v1621_v24, %v1613_v19  ;;  %vm727_vm4 = vcmp.le.f32.partialorder %v680_v9, %v1623_v25  ;;  %v1663_v14 = vld [vmem:[%s1449_s23 + $0x8] sm:$0xff] }
 0x1b5   : > { %v940_v31 = vsel %vm899_vm3, %v1621_v24, %v1613_v19  ;;  %vm728_vm5 = vcmp.le.f32.partialorder %v681_v15, %v1623_v25  ;;  %vm895_vm6 = vcmp.lt.f32.partialorder %v1623_v25, %v1616_v20  ;;  %v743_v1 = vsel %vm727_vm4, %v1610_v46, 1073741824 }
 0x1b6   : > { %948 = vst.msk [vmem:[%s1449_s23 + $0x20] sm:$0xff] %vm322_vm0, %v940_v31  ;;  %v936_v2 = vsel %vm895_vm6, %v1623_v25, %v1616_v20  ;;  %v744_v8 = vsel %vm728_vm5, %v1619_v21, 1073741824  ;;  %v751_v6 = vsel %vm735_vm1, %v1610_v46, 1073741824  ;;  %v752_v9 = vsel %vm736_vm2, %v1619_v21, 1073741824  ;;  %v904_v20 = vld [vmem:[%s1455_s11 + $0x8] sm:$0xff] }
 0x1b7   : > { %944 = vst.msk [vmem:[%s1449_s23] sm:$0xff] %vm322_vm0, %v936_v2  ;;  %vm759_vm7 = vcmp.lt.s32.totalorder %v743_v1, %v744_v8  ;;  %vm823_vm8 = vcmp.lt.s32.totalorder %v751_v6, %v752_v9 }
 0x1b8   : > { %v1665_v15 = vpop.xlane.xlu0 %712  ;;  %v1667_v26 = vpop.xlane.xlu1 %700  ;;  %v1669_v27 = vsel %vm759_vm7, %v743_v1, %v744_v8  ;;  %v1676_v28 = vsel %vm823_vm8, %v751_v6, %v752_v9 }
 0x1b9   : > { %vm2076_vm9 = vcmp.lt.f32.partialorder %v1665_v15, %v1655_v5  ;;  %vm729_vm10 = vcmp.le.f32.partialorder %v682_v23, %v1667_v26  ;;  %vm730_vm11 = vcmp.le.f32.partialorder %v683_v48, %v1667_v26  ;;  %vm896_vm12 = vcmp.lt.f32.partialorder %v1667_v26, %v1663_v14 }
 0x1ba   : > { %v941_v29 = vsel %vm2076_vm9, %v1665_v15, %v1655_v5  ;;  %v762_v23 = vshra.s32 %v1669_v27, 16  ;;  %v937_v30 = vsel %vm896_vm12, %v1667_v26, %v1663_v14  ;;  %v826_v35 = vshra.s32 %v1676_v28, 16 }
 0x1bb   : > { %949 = vst.msk [vmem:[%s1449_s23 + $0x28] sm:$0xff] %vm322_vm0, %v941_v29  ;;  %945 = vst.msk [vmem:[%s1449_s23 + $0x8] sm:$0xff] %vm322_vm0, %v937_v30  ;;  %v745_v37 = vsel %vm729_vm10, %v1610_v46, 1073741824  ;;  %v746_v38 = vsel %vm730_vm11, %v1619_v21, 1073741824  ;;  %vm1725_vm14 = vcmp.le.f32.partialorder %v690_v22, %v1665_v15  ;;  %vm1737_vm15 = vcmp.le.f32.partialorder %v691_v47, %v1665_v15 }
 0x1bc   : > { %v1701_v17 = vpop.xlane.xlu1 %715  ;;  %v1703_v33 = vpop.xlane.xlu0 %703  ;;  %v1705_v34 = vcvt.s32.f32 %v762_v23  ;;  %vm775_vm2 = vcmp.lt.s32.totalorder %v745_v37, %v746_v38  ;;  %v1764_v47 = vcvt.s32.f32 %v826_v35  ;;  %v753_v55 = vsel %vm1725_vm14, %v1610_v46, 1073741824 }
 0x1bd   : > { %v1711_v39 = vld [vmem:[%s1449_s23 + $0x20] sm:$0xff]  ;;  %vm2075_vm13 = vcmp.lt.f32.partialorder %v1701_v17, %v1689_v11  ;;  %vm1744_vm1 = vcmp.le.f32.partialorder %v684_v59, %v1703_v33  ;;  %vm1756_vm4 = vcmp.le.f32.partialorder %v685_v60, %v1703_v33  ;;  %vm897_vm5 = vcmp.lt.f32.partialorder %v1703_v33, %v1716_v40 }
 0x1be   : > { %1290 = vrsqrt.f32 %v1711_v39  ;;  %v1720_v41 = vld [vmem:[%s1449_s23] sm:$0xff]  ;;  %765 = vmin.xlane.f32.xlu1 %v1705_v34  ;;  %v942_v22 = vsel %vm2075_vm13, %v1701_v17, %v1689_v11  ;;  %v938_v48 = vsel %vm897_vm5, %v1703_v33, %v1716_v40  ;;  %v1786_v53 = vsel %vm775_vm2, %v745_v37, %v746_v38 }
 0x1bf   : > { %1292 = vrsqrt.f32 %v1720_v41  ;;  %950 = vst.msk [vmem:[%s1449_s23 + $0x30] sm:$0xff] %vm322_vm0, %v942_v22  ;;  %946 = vst.msk [vmem:[%s1449_s23 + $0x10] sm:$0xff] %vm322_vm0, %v938_v48  ;;  %v754_v36 = vsel %vm1737_vm15, %v1619_v21, 1073741824  ;;  %vm1804_vm8 = vcmp.le.f32.partialorder %v692_v57, %v1701_v17  ;;  %v747_v63 = vsel %vm1744_vm1, %v1610_v46, 1073741824 }
 0x1c0   : > { %v1762_v45 = vpop.xlane.xlu0 %706  ;;  %v748_v0 = vsel %vm1756_vm4, %v1619_v21, 1073741824  ;;  %vm993_vm10 = vcmp.eq.f32.partialorder %v1711_v39, inf  ;;  %vm995_vm11 = vcmp.eq.f32.partialorder %v1711_v39, 0.0  ;;  %vm1822_vm14 = vcmp.le.f32.partialorder %v693_v58, %v1701_v17 }
 0x1c1   : > { %vm2073_vm7 = vcmp.lt.f32.partialorder %v1762_v45, %v1731_v43  ;;  %v996_v51 = vand.u32 2147483648, %v1711_v39  ;;  %vm965_vm15 = vcmp.eq.f32.partialorder %v1720_v41, inf  ;;  %v778_v18 = vshra.s32 %v1786_v53, 16 }
 0x1c2   : > { %v1776_v49 = vld [vmem:[%s1449_s23 + $0x28] sm:$0xff]  ;;  %v939_v50 = vsel %vm2073_vm7, %v1762_v45, %v1731_v43  ;;  %829 = vmin.xlane.f32.xlu1 %v1764_v47  ;;  %vm967_vm2 = vcmp.eq.f32.partialorder %v1720_v41, 0.0  ;;  %vm791_vm4 = vcmp.lt.s32.totalorder %v747_v63, %v748_v0  ;;  %vm839_vm7 = vcmp.lt.s32.totalorder %v753_v55, %v754_v36 }
 0x1c3   : > { %1294 = vrsqrt.f32 %v1776_v49  ;;  %v1799_v59 = vld [vmem:[%s1449_s23 + $0x8] sm:$0xff]  ;;  %947 = vst.msk [vmem:[%s1449_s23 + $0x18] sm:$0xff] %vm322_vm0, %v939_v50  ;;  %v968_v58 = vand.u32 2147483648, %v1720_v41  ;;  %v1840_v31 = vcvt.s32.f32 %v778_v18  ;;  %v1844_v1 = vsel %vm791_vm4, %v747_v63, %v748_v0 }
 0x1c4   : > { %1296 = vrsqrt.f32 %v1799_v59  ;;  %v1826_v57 = vpop.xlane.xlu0 %718  ;;  %v1846_v2 = vsel %vm839_vm7, %v753_v55, %v754_v36  ;;  %vm1861_vm13 = vcmp.le.f32.partialorder %v687_v4, %v1762_v45  ;;  %v755_v23 = vsel %vm1804_vm8, %v1610_v46, 1073741824 }
 0x1c5   : > { %vm2074_vm1 = vcmp.lt.f32.partialorder %v1826_v57, %v1789_v54  ;;  %v756_v61 = vsel %vm1822_vm14, %v1619_v21, 1073741824  ;;  %781 = vmin.xlane.f32.xlu0 %v1840_v31  ;;  %v794_v56 = vshra.s32 %v1844_v1, 16  ;;  %v842_v4 = vshra.s32 %v1846_v2, 16 }
 0x1c6   : > { %v943_v32 = vsel %vm2074_vm1, %v1826_v57, %v1789_v54  ;;  %v1849_v6 = vld [vmem:[%s1449_s23 + $0x30] sm:$0xff]  ;;  %vm1854_vm1 = vcmp.le.f32.partialorder %v686_v3, %v1762_v45  ;;  %vm1000_vm7 = vcmp.eq.f32.partialorder %v1776_v49, inf  ;;  %vm1002_vm8 = vcmp.eq.f32.partialorder %v1776_v49, 0.0 }
 0x1c7   : > { %951 = vst.msk [vmem:[%s1449_s23 + $0x38] sm:$0xff] %vm322_vm0, %v943_v32  ;;  %1298 = vrsqrt.f32 %v1849_v6  ;;  %v1874_v35 = vld [vmem:[%s1449_s23 + $0x10] sm:$0xff]  ;;  %v1003_v44 = vand.u32 2147483648, %v1776_v49  ;;  %vm855_vm14 = vcmp.lt.s32.totalorder %v755_v23, %v756_v61  ;;  %vm972_vm4 = vcmp.eq.f32.partialorder %v1799_v59, inf }
 0x1c8   : > { %v1291_v8 = vpop.eup %1290  ;;  %1300 = vrsqrt.f32 %v1874_v35  ;;  %vm1900_vm9 = vcmp.le.f32.partialorder %v694_v12, %v1826_v57  ;;  %v1908_v50 = vcvt.s32.f32 %v794_v56  ;;  %v1910_v55 = vcvt.s32.f32 %v842_v4 }
 0x1c9   : > { %v1293_v30 = vpop.eup %1292  ;;  %v992_v3 = vmul.f32 %v1291_v8, %v1711_v39  ;;  %v749_v36 = vsel %vm1854_vm1, %v1610_v46, 1073741824  ;;  %v1927_v63 = vsel %vm855_vm14, %v755_v23, %v756_v61  ;;  %v750_v0 = vsel %vm1861_vm13, %v1619_v21, 1073741824 }
 0x1ca   : > { %v964_v37 = vmul.f32 %v1293_v30, %v1720_v41  ;;  %v1884_v38 = vld [vmem:[%s1449_s23 + $0x18] sm:$0xff]  ;;  %797 = vmin.xlane.f32.xlu1 %v1908_v50  ;;  %845 = vmin.xlane.f32.xlu0 %v1910_v55  ;;  %v757_v62 = vsel %vm1900_vm9, %v1610_v46, 1073741824  ;;  %v858_v18 = vshra.s32 %v1927_v63, 16  ;;  %vm807_vm13 = vcmp.lt.s32.totalorder %v749_v36, %v750_v0 }
 0x1cb   : > { %v994_v42 = vsel %vm993_vm10, %v1711_v39, %v992_v3  ;;  %1302 = vrsqrt.f32 %v1884_v38  ;;  %vm1921_vm10 = vcmp.le.f32.partialorder %v695_v13, %v1826_v57  ;;  %v1949_v8 = vsel %vm807_vm13, %v749_v36, %v750_v0 }
 0x1cc   : > { %v997_v10 = vsel %vm995_vm11, %v996_v51, %v994_v42  ;;  %v966_v22 = vsel %vm965_vm15, %v1720_v41, %v964_v37  ;;  %vm974_vm11 = vcmp.eq.f32.partialorder %v1799_v59, 0.0  ;;  %v975_v51 = vand.u32 2147483648, %v1799_v59 }
 0x1cd   : > { %v1295_v48 = vpop.eup %1294  ;;  %1023 = vst.msk [vmem:[%s1449_s23 + $0x20] sm:$0xff] %vm322_vm0, %v997_v10  ;;  %v969_v39 = vsel %vm967_vm2, %v968_v58, %v966_v22  ;;  %v758_v46 = vsel %vm1921_vm10, %v1619_v21, 1073741824  ;;  %v1956_v29 = vcvt.s32.f32 %v858_v18  ;;  %v810_v23 = vshra.s32 %v1949_v8, 16 }
 0x1ce   : > { %v1297_v60 = vpop.eup %1296  ;;  %1019 = vst.msk [vmem:[%s1449_s23] sm:$0xff] %vm322_vm0, %v969_v39  ;;  %v999_v7 = vmul.f32 %v1295_v48, %v1776_v49  ;;  %v962_v41 = vld [vmem:[%s1449_s23 + $0x38] sm:$0xff]  ;;  %vm871_vm9 = vcmp.lt.s32.totalorder %v757_v62, %v758_v46  ;;  %vm1007_vm15 = vcmp.eq.f32.partialorder %v1849_v6, inf  ;;  %vm1009_vm1 = vcmp.eq.f32.partialorder %v1849_v6, 0.0 }
 0x1cf   : > { %v971_v52 = vmul.f32 %v1297_v60, %v1799_v59  ;;  %1304 = vrsqrt.f32 %v962_v41  ;;  %861 = vmin.xlane.f32.xlu1 %v1956_v29  ;;  %v1967_v21 = vcvt.s32.f32 %v810_v23  ;;  %v1010_v4 = vand.u32 2147483648, %v1849_v6 }
 0x1d0   : > { %v1001_v13 = vsel %vm1000_vm7, %v1776_v49, %v999_v7  ;;  %vm979_vm2 = vcmp.eq.f32.partialorder %v1874_v35, inf  ;;  %vm981_vm7 = vcmp.eq.f32.partialorder %v1874_v35, 0.0  ;;  %v989_v39 = vand.u32 2147483648, %v1884_v38 }
 0x1d1   : > { %v1004_v32 = vsel %vm1002_vm8, %v1003_v44, %v1001_v13  ;;  %v973_v58 = vsel %vm972_vm4, %v1799_v59, %v971_v52  ;;  %v1299_v49 = vpop.eup %1298  ;;  %v1962_v59 = vsel %vm871_vm9, %v757_v62, %v758_v46  ;;  %v982_v44 = vand.u32 2147483648, %v1874_v35  ;;  %813 = vmin.xlane.f32.xlu0 %v1967_v21 }
 0x1d2   : > { %1024 = vst.msk [vmem:[%s1449_s23 + $0x28] sm:$0xff] %vm322_vm0, %v1004_v32  ;;  %v976_v9 = vsel %vm974_vm11, %v975_v51, %v973_v58  ;;  %v1301_v61 = vpop.eup %1300  ;;  %v1006_v30 = vmul.f32 %v1299_v49, %v1849_v6  ;;  %v874_v3 = vshra.s32 %v1962_v59, 16  ;;  %vm986_vm8 = vcmp.eq.f32.partialorder %v1884_v38, inf }
 0x1d3   : > { %1020 = vst.msk [vmem:[%s1449_s23 + $0x8] sm:$0xff] %vm322_vm0, %v976_v9  ;;  %v978_v37 = vmul.f32 %v1301_v61, %v1874_v35  ;;  %vm988_vm14 = vcmp.eq.f32.partialorder %v1884_v38, 0.0  ;;  %vm1014_vm4 = vcmp.eq.f32.partialorder %v962_v41, inf  ;;  %vm1016_vm10 = vcmp.eq.f32.partialorder %v962_v41, 0.0 }
 0x1d4   : > { %v1008_v42 = vsel %vm1007_vm15, %v1849_v6, %v1006_v30  ;;  %v1978_v22 = vcvt.s32.f32 %v874_v3  ;;  %v761_v62 = vand.u32 65535, %v1669_v27  ;;  %v825_v51 = vand.u32 65535, %v1676_v28 }
 0x1d5   : > { %v1303_v56 = vpop.eup %1302  ;;  %v1011_v16 = vsel %vm1009_vm1, %v1010_v4, %v1008_v42  ;;  %v980_v48 = vsel %vm979_vm2, %v1874_v35, %v978_v37  ;;  %v1017_v35 = vand.u32 2147483648, %v962_v41  ;;  %v793_v49 = vand.u32 65535, %v1844_v1 }
 0x1d6   : > { %v985_v10 = vmul.f32 %v1303_v56, %v1884_v38  ;;  %1025 = vst.msk [vmem:[%s1449_s23 + $0x30] sm:$0xff] %vm322_vm0, %v1011_v16  ;;  %v983_v6 = vsel %vm981_vm7, %v982_v44, %v980_v48  ;;  %877 = vmin.xlane.f32.xlu0 %v1978_v22  ;;  %v827_v58 = vcvt.s32.f32 %v825_v51  ;;  %v841_v28 = vand.u32 65535, %v1846_v2 }
 0x1d7   : > { %1021 = vst.msk [vmem:[%s1449_s23 + $0x10] sm:$0xff] %vm322_vm0, %v983_v6  ;;  %v795_v30 = vcvt.s32.f32 %v793_v49 }
 0x1d8   : > { %v987_v36 = vsel %vm986_vm8, %v1884_v38, %v985_v10  ;;  %v763_v38 = vcvt.s32.f32 %v761_v62  ;;  %v843_v3 = vcvt.s32.f32 %v841_v28 }
 0x1d9   : > { %v1305_v60 = vpop.eup %1304  ;;  %v990_v7 = vsel %vm988_vm14, %v989_v39, %v987_v36 }
 0x1da   : > { %1022 = vst.msk [vmem:[%s1449_s23 + $0x18] sm:$0xff] %vm322_vm0, %v990_v7  ;;  %v1013_v12 = vmul.f32 %v1305_v60, %v962_v41 }
 0x1dc   : > { %v1015_v0 = vsel %vm1014_vm4, %v962_v41, %v1013_v12  ;;  %v777_v41 = vand.u32 65535, %v1786_v53 }
 0x1dd   : > { %v1018_v52 = vsel %vm1016_vm10, %v1017_v35, %v1015_v0 }
 0x1de   : > { %1026 = vst.msk [vmem:[%s1449_s23 + $0x38] sm:$0xff] %vm322_vm0, %v1018_v52  ;;  %v779_v23 = vcvt.s32.f32 %v777_v41 }
 0x24b   : > { %v766_v13 = vpop.xlane.xlu1 %765 }
 0x24c   : > { %vm767_vm11 = vcmp.eq.f32.partialorder %v1705_v34, %v766_v13 }
 0x24d   : > { %v768_v18 = vsel %vm767_vm11, %v763_v38, inf }
 0x24e   : > { %769 = vmin.xlane.f32.xlu1 %v768_v18 }
 0x24f   : > { %v830_v32 = vpop.xlane.xlu1 %829 }
 0x250   : > { %vm831_vm13 = vcmp.eq.f32.partialorder %v1764_v47, %v830_v32  ;;  %v857_v47 = vand.u32 65535, %v1927_v63  ;;  %v836_v48 = vcvt.f32.s32 %v830_v32 }
 0x251   : > { %v832_v46 = vsel %vm831_vm13, %v827_v58, inf }
 0x252   : > { %833 = vmin.xlane.f32.xlu1 %v832_v46  ;;  %v782_v9 = vpop.xlane.xlu0 %781  ;;  %v859_v4 = vcvt.s32.f32 %v857_v47  ;;  %v837_v36 = vshll.u32 %v836_v48, 16  ;;  %v909_v47 = vld [vmem:[%s1455_s11 + $0x30] sm:$0xff] }
 0x253   : > { %vm783_vm9 = vcmp.eq.f32.partialorder %v1840_v31, %v782_v9  ;;  %v809_v31 = vand.u32 65535, %v1949_v8  ;;  %v788_v35 = vcvt.f32.s32 %v782_v9 }
 0x254   : > { %v784_v27 = vsel %vm783_vm9, %v779_v23, inf  ;;  %v905_v23 = vld [vmem:[%s1455_s11 + $0x10] sm:$0xff] }
 0x255   : > { %785 = vmin.xlane.f32.xlu0 %v784_v27  ;;  %v811_v42 = vcvt.s32.f32 %v809_v31  ;;  %v789_v62 = vshll.u32 %v788_v35, 16  ;;  %v908_v27 = vld [vmem:[%s1455_s11 + $0x28] sm:$0xff] }
 0x257   : > { %v798_v34 = vpop.xlane.xlu1 %797  ;;  %v846_v61 = vpop.xlane.xlu0 %845 }
 0x258   : > { %vm799_vm15 = vcmp.eq.f32.partialorder %v1908_v50, %v798_v34  ;;  %vm847_vm1 = vcmp.eq.f32.partialorder %v1910_v55, %v846_v61  ;;  %v873_v50 = vand.u32 65535, %v1962_v59  ;;  %v903_v59 = vld [vmem:[%s1455_s11] sm:$0xff]  ;;  %v804_v25 = vcvt.f32.s32 %v798_v34 }
 0x259   : > { %v800_v53 = vsel %vm799_vm15, %v795_v30, inf  ;;  %v848_v56 = vsel %vm847_vm1, %v843_v3, inf  ;;  %v852_v38 = vcvt.f32.s32 %v846_v61 }
 0x25a   : > { %801 = vmin.xlane.f32.xlu1 %v800_v53  ;;  %849 = vmin.xlane.f32.xlu0 %v848_v56  ;;  %v875_v44 = vcvt.s32.f32 %v873_v50  ;;  %v805_v24 = vshll.u32 %v804_v25, 16  ;;  %v910_v50 = vld [vmem:[%s1455_s11 + $0x38] sm:$0xff] }
 0x25b   : > { %v853_v58 = vshll.u32 %v852_v38, 16 }
 0x25c   : > { %v862_v1 = vpop.xlane.xlu1 %861 }
 0x25d   : > { %vm863_vm2 = vcmp.eq.f32.partialorder %v1956_v29, %v862_v1  ;;  %v772_v29 = vcvt.f32.s32 %v766_v13  ;;  %v868_v9 = vcvt.f32.s32 %v862_v1  ;;  %v906_v1 = vld [vmem:[%s1455_s11 + $0x18] sm:$0xff] }
 0x25e   : > { %v814_v2 = vpop.xlane.xlu0 %813  ;;  %v864_v37 = vsel %vm863_vm2, %v859_v4, inf }
 0x25f   : > { %865 = vmin.xlane.f32.xlu1 %v864_v37  ;;  %vm815_vm7 = vcmp.eq.f32.partialorder %v1967_v21, %v814_v2  ;;  %v773_v16 = vshll.u32 %v772_v29, 16  ;;  %v820_v34 = vcvt.f32.s32 %v814_v2  ;;  %v869_v30 = vshll.u32 %v868_v9, 16 }
 0x260   : > { %v816_v55 = vsel %vm815_vm7, %v811_v42, inf }
 0x261   : > { %817 = vmin.xlane.f32.xlu0 %v816_v55  ;;  %v821_v56 = vshll.u32 %v820_v34, 16 }
 0x263   : > { %v878_v63 = vpop.xlane.xlu0 %877 }
 0x264   : > { %vm879_vm8 = vcmp.eq.f32.partialorder %v1978_v22, %v878_v63  ;;  %v907_v22 = vld [vmem:[%s1455_s11 + $0x20] sm:$0xff]  ;;  %v884_v33 = vcvt.f32.s32 %v878_v63 }
 0x265   : > { %v880_v8 = vsel %vm879_vm8, %v875_v44, inf }
 0x266   : > { %881 = vmin.xlane.f32.xlu0 %v880_v8  ;;  %v885_v2 = vshll.u32 %v884_v33, 16 }
 0x2db   : > { %v770_v10 = vpop.xlane.xlu1 %769 }
 0x2dc   : > { %v771_v39 = vcvt.f32.s32 %v770_v10 }
 0x2de   : > { %v774_v6 = vadd.s32 %v773_v16, %v771_v39 }
 0x2df   : > { %v834_v21 = vpop.xlane.xlu1 %833 }
 0x2e0   : > { %v911_v60 = vsel %vm895_vm6, %v774_v6, %v903_v59  ;;  %v835_v7 = vcvt.f32.s32 %v834_v21  ;;  %vm2098_vm6 = vcmp.lt.f32.partialorder %v1701_v17, %v1689_v11 }
 0x2e1   : > { %920 = vst.msk [vmem:[%s1455_s11] sm:$0xff] %vm322_vm0, %v911_v60 }
 0x2e2   : > { %v838_v12 = vadd.s32 %v837_v36, %v835_v7  ;;  %v786_v52 = vpop.xlane.xlu0 %785 }
 0x2e3   : > { %v787_v13 = vcvt.f32.s32 %v786_v52 }
 0x2e4   : > { %v915_v0 = vsel %vm899_vm3, %v838_v12, %v907_v22  ;;  %vm2097_vm3 = vcmp.lt.f32.partialorder %v1665_v15, %v1655_v5 }
 0x2e5   : > { %924 = vst.msk [vmem:[%s1455_s11 + $0x20] sm:$0xff] %vm322_vm0, %v915_v0  ;;  %v790_v51 = vadd.s32 %v789_v62, %v787_v13 }
 0x2e7   : > { %v912_v18 = vsel %vm896_vm12, %v790_v51, %v904_v20  ;;  %v802_v32 = vpop.xlane.xlu1 %801  ;;  %v850_v19 = vpop.xlane.xlu0 %849  ;;  %vm2099_vm12 = vcmp.lt.f32.partialorder %v1762_v45, %v1731_v43 }
 0x2e8   : > { %921 = vst.msk [vmem:[%s1455_s11 + $0x8] sm:$0xff] %vm322_vm0, %v912_v18  ;;  %v803_v46 = vcvt.f32.s32 %v802_v32  ;;  %v851_v41 = vcvt.f32.s32 %v850_v19 }
 0x2ea   : > { %v806_v49 = vadd.s32 %v805_v24, %v803_v46  ;;  %v854_v28 = vadd.s32 %v853_v58, %v851_v41 }
 0x2ec   : > { %v913_v14 = vsel %vm897_vm5, %v806_v49, %v905_v23  ;;  %v916_v26 = vsel %vm2097_vm3, %v854_v28, %v908_v27  ;;  %v866_v61 = vpop.xlane.xlu1 %865  ;;  %vm2100_vm5 = vcmp.lt.f32.partialorder %v1826_v57, %v1789_v54 }
 0x2ed   : > { %922 = vst.msk [vmem:[%s1455_s11 + $0x10] sm:$0xff] %vm322_vm0, %v913_v14  ;;  %925 = vst.msk [vmem:[%s1455_s11 + $0x28] sm:$0xff] %vm322_vm0, %v916_v26  ;;  %v867_v3 = vcvt.f32.s32 %v866_v61 }
 0x2ee   : > { %v818_v53 = vpop.xlane.xlu0 %817 }
 0x2ef   : > { %v870_v40 = vadd.s32 %v869_v30, %v867_v3  ;;  %v819_v31 = vcvt.f32.s32 %v818_v53 }
 0x2f1   : > { %v917_v5 = vsel %vm2098_vm6, %v870_v40, %v909_v47  ;;  %v822_v15 = vadd.s32 %v821_v56, %v819_v31 }
 0x2f2   : > { %926 = vst.msk [vmem:[%s1455_s11 + $0x30] sm:$0xff] %vm322_vm0, %v917_v5 }
 0x2f3   : > { %v882_v4 = vpop.xlane.xlu0 %881  ;;  %v914_v37 = vsel %vm2099_vm12, %v822_v15, %v906_v1 }
 0x2f4   : > { %v883_v42 = vcvt.f32.s32 %v882_v4  ;;  %923 = vst.msk [vmem:[%s1455_s11 + $0x18] sm:$0xff] %vm322_vm0, %v914_v37 }
 0x2f6   : > { %v886_v55 = vadd.s32 %v885_v2, %v883_v42 }
 0x2f8   : > { %v918_v63 = vsel %vm2100_vm5, %v886_v55, %v910_v50 }
 0x2f9   : > { %927 = vst.msk [vmem:[%s1455_s11 + $0x38] sm:$0xff] %vm322_vm0, %v918_v63 }
 0x2fa PF: > { %s16_s20 = sadd.s32 1, %s1328_s20   ;;  %s2101_s18 = smov %s1324_s19 }
 0x2fb   : > { %p13_p5 = scmp.ge.s32.totalorder %s16_s20, 4   ;;  %s2102_s19 = smov %s2104_s21 }
 0x2fd   :  { %15 = sbr.rel (!%p13_p5) target bundleno = 2 (0x2), region = 95 }

// kernel: classifier_patchcore_forward.8
= control target key start
LH: loop header
LB: loop body
LE: loop exit
PB: predicated region body
PF: predicated region fallthrough
CT: control target
= control target key end

     0   :  { %v283_v1 = vmov 0   ;;  %v200_v19 = vlaneseq  ;;  %s369_s2 = inlined_call_operand.vmem [shape: bf16[256,128], index: 2, kind: input, shape index: {}]   ;;  %s370_s0 = inlined_call_operand.vmem [shape: bf16[2,128], index: 0, kind: input, shape index: {}]   ;;  %s371_s1 = inlined_call_operand.vmem [shape: f32[2,1], index: 1, kind: input, shape index: {}]   ;;  %s372_s3 = inlined_call_operand.vmem [shape: f32[1,256], index: 3, kind: input, shape index: {}]   ;;  %s373_s4 = inlined_call_operand.vmem [shape: f32[2,256], index: 4, kind: output, shape index: {}]  }
   0x1   :  { %v267_v0 = vld [vmem:[%s369_s2 + $0x40] sm:$0xff]   ;;  %266 = vset.pattern.permute.xlu0 %v283_v1  ;;  %v269_v3 = vld [vmem:[%s369_s2 + $0x48] sm:$0xff]   ;;  %v271_v5 = vld [vmem:[%s369_s2 + $0x50] sm:$0xff]  }
   0x2   :  { %v268_v2 = vld [vmem:[%s369_s2] sm:$0xff]   ;;  %247 = vmatprep.subr.bf16.mxu0 %v267_v0  ;;  %v270_v4 = vld [vmem:[%s369_s2 + $0x8] sm:$0xff]   ;;  %v272_v6 = vld [vmem:[%s369_s2 + $0x10] sm:$0xff]   ;;  %v201_v20 = vshrl.u32 %v200_v19, 7 }
   0x3   :  { %248 = vmatpush3.bf16.xpose.msra.mxu0 %v268_v2  ;;  %v273_v7 = vld [vmem:[%s369_s2 + $0x58] sm:$0xff]   ;;  %v18_v8 = vld [vmem:[%s370_s0] sm:$0x1]  ;;  %v277_v13 = vld [vmem:[%s369_s2 + $0x68] sm:$0xff]  }
   0x4   :  { %249 = vmatprep.subr.bf16.mxu0 %v269_v3  ;;  %v188_v9 = vld [vmem:[%s371_s1] sm:$0x3]  ;;  %263 = vmatprep.mubr.bf16.mxu0 %v18_v8  ;;  %v274_v10 = vld [vmem:[%s369_s2 + $0x18] sm:$0xff]   ;;  %v278_v14 = vld [vmem:[%s369_s2 + $0x28] sm:$0xff]   ;;  %v202_v21 = vsub.s32 0, %v201_v20  ;;  %v206_v23 = vsub.s32 1, %v201_v20 }
   0x5   :  { %193 = vperm.xlu0 %266, %v188_v9   ;;  %v275_v11 = vld [vmem:[%s369_s2 + $0x60] sm:$0xff]   ;;  %v279_v15 = vld [vmem:[%s369_s2 + $0x70] sm:$0xff]   ;;  %v281_v17 = vld [vmem:[%s369_s2 + $0x78] sm:$0xff]  }
   0x6   :  { %v276_v12 = vld [vmem:[%s369_s2 + $0x20] sm:$0xff]   ;;  %v280_v16 = vld [vmem:[%s369_s2 + $0x30] sm:$0xff]   ;;  %v282_v18 = vld [vmem:[%s369_s2 + $0x38] sm:$0xff]  }
   0x7   :  { %v198_v22 = vld [vmem:[%s372_s3] sm:$0x3] }
   0x8   :  { %v203_v28 = vrot.slane %v198_v22, %v202_v21  ;;  %v207_v30 = vrot.slane %v198_v22, %v206_v23 }
   0xb   :  { %250 = vmatpush3.bf16.xpose.msra.mxu0 %v270_v4 }
   0xc   :  { %251 = vmatprep.subr.bf16.mxu0 %v271_v5 }
  0x13   :  { %252 = vmatpush3.bf16.xpose.msra.mxu0 %v272_v6 }
  0x14   :  { %253 = vmatprep.subr.bf16.mxu0 %v273_v7 }
  0x1b   :  { %254 = vmatpush3.bf16.xpose.msra.mxu0 %v274_v10 }
  0x1c   :  { %255 = vmatprep.subr.bf16.mxu0 %v275_v11 }
  0x23   :  { %256 = vmatpush3.bf16.xpose.msra.mxu0 %v276_v12 }
  0x24   :  { %257 = vmatprep.subr.bf16.mxu0 %v277_v13 }
  0x2b   :  { %258 = vmatpush3.bf16.xpose.msra.mxu0 %v278_v14 }
  0x2c   :  { %259 = vmatprep.subr.bf16.mxu0 %v279_v15 }
  0x33   :  { %260 = vmatpush3.bf16.xpose.msra.mxu0 %v280_v16 }
  0x34   :  { %261 = vmatprep.subr.bf16.mxu0 %v281_v17 }
  0x3b   :  { %262 = vmatpush3.bf16.xpose.msra.mxu0 %v282_v18 }
  0x42   :  { %264 = vmatmul.mubr.bf16.vlgmr.msra.gmra.mrb[0].mxu0 %v18_v8 }
  0x84   :  { %v194_v25 = vpop.permute.xlu0 %193 }
 0x115   :  { %v181_v24 = vpop.f32.mrb[0].mxu0 }
 0x116   :  { %v189_v26 = vmul.f32 2.0, %v181_v24  ;;  %v183_v27 = vpop.f32.mrb[1].mxu0 }
 0x117   :  { %v190_v29 = vmul.f32 2.0, %v183_v27  ;;  %v185_v31 = vpop.f32.mrb[2].mxu0 }
 0x118   :  { %v196_v32 = vsub.f32 %v194_v25, %v189_v26  ;;  %v186_v33 = vpop.f32.mrb[3].mxu0 }
 0x119   :  { %v197_v34 = vsub.f32 %v194_v25, %v190_v29 }
 0x11a   :  { %v210_v35 = vadd.f32 %v203_v28, %v196_v32 }
 0x11b   :  { %v211_v36 = vadd.f32 %v207_v30, %v197_v34 }
 0x11c   :  { %v212_v37 = vmax.f32 %v210_v35, 0.0 }
 0x11d   :  { %v213_v38 = vmax.f32 %v211_v36, 0.0 }
 0x11f   :  { %v216_v39 = vcombine.low %v212_v37, %v213_v38 }
 0x121   :  { %246 = vst.sshfl [vmem:[%s373_s4] sm:$0x33 pattern:$0x76325410] %v216_v39 }

// kernel: classifier_patchcore_forward.9
= control target key start
LH: loop header
LB: loop body
LE: loop exit
PB: predicated region body
PF: predicated region fallthrough
CT: control target
= control target key end

     0   :  { %8 = vsyncpa [#allocation3], 0  ;;  %s739_s0 = inlined_call_operand.vmem [shape: bf16[2,8,8], index: 0, kind: input, shape index: {}]   ;;  %s740_s1 = inlined_call_operand.vmem [shape: bf16[48,8], index: 1, kind: input, shape index: {}]   ;;  %s741_s2 = inlined_call_operand.vmem [shape: bf16[8,48], index: 2, kind: input, shape index: {}]   ;;  %s742_s3 = inlined_call_operand.hbm [shape: f32[2,48,48], index: 3, kind: output, shape index: {}]  }
   0x1   :  { %10 = vsyncpa [#allocation3 + $0x1], 0  ;;  %s606_s12 = smov 0   ;;  %s608_s13 = smov 0  }
   0x2   :  { %s610_s14 = smov 0   ;;  %s612_s15 = smov 0  }
   0x3 LB: > { %s627_s16 = sadd.s32 4294967295, %s579_s15   ;;  %s416_s17 = sadd.s32 4294967294, %s579_s15   ;;  %s579_s15 = sphi %s612_s15, %s748_s15   ;;  %s575_s14 = sphi %s610_s14, %s747_s14   ;;  %s571_s13 = sphi %s608_s13, %s746_s13   ;;  %s567_s12 = sphi %s606_s12, %s745_s12  }
   0x4   : > { %s631_s18 = sadd.s32 1, %s579_s15   ;;  %s91_s19 = sadd.s32 1, %s575_s14 }
   0x5   : > { %s88_s20 = ssub.s32 %s579_s15, %s631_s18  ;;  %p101_p0 = scmp.ne.s32.totalorder %s575_s14, %s571_s13 }
   0x6   : > { %p89_p1 = scmp.eq.s32.totalorder %s88_s20, 0  ;;  %p102_p2 = scmp.eq.s32.totalorder %s627_s16, 1 }
   0x7   : > { %p107_p3 = scmp.ne.s32.totalorder %s571_s13, %s567_s12  ;;  %p108_p4 = scmp.eq.s32.totalorder %s416_s17, 1 }
   0x8   : > { %s642_s21 = scalar_select %p89_p1, %s575_s14, %s91_s19  }
   0x9   : > { %p644_p5 = por %p102_p2, %p101_p0  ;;  %p648_p6 = por %p108_p4, %p107_p3 }
   0xa   : > { %p419_p7 = scmp.ge.s32.totalorder %s579_s15, 1  ;;  %p139_p8 = scmp.lt.s32.totalorder %s579_s15, 3 }
   0xc   : > { %p140_p9 = pnand %p419_p7, %p139_p8 }
   0xd   : > { %p162_p10 = scmp.lt.s32.totalorder (!%p140_p9), %s627_s16, 1  ;;  %v581_v0 = vmov (!%p140_p9), 0.0   ;;  %vm582_vm0 = vmmov (!%p140_p9), 0   ;;  %vm199_vm1 = vcmask (!%p140_p9), 1043456   ;;  %v514_v3 = vld [vmem:[%s740_s1] sm:$0xff] (!%p140_p9)   ;;  %vm189_vm2 = vcmask (!%p140_p9), 64512  }
   0xe   : > { %143 = sbr.rel (%p140_p9) target bundleno = 491 (0x1eb), region = 32  ;;  %441 = vmatprep.subr.bf16.mxu0 (!%p140_p9), %v581_v0  ;;  %443 = vmatprep.mubr.msk.bf16.mxu0 (!%p140_p9), %vm582_vm0, %v581_v0  ;;  %v515_v4 = vld [vmem:[%s740_s1 + $0x8] sm:$0xff] (!%p140_p9)   ;;  %v516_v5 = vld [vmem:[%s740_s1 + $0x10] sm:$0xff] (!%p140_p9)   ;;  %v263_v6 = vld [vmem:[%s741_s2] sm:$0xf] (!%p140_p9)  ;;  %s159_s10 = sand.u32 (!%p140_p9), 1, %s571_s13  }
   0xf   : > { %455 = vmatprep.subr.bf16.mxu1 (!%p140_p9), %v581_v0  ;;  %457 = vmatprep.mubr.msk.bf16.mxu1 (!%p140_p9), %vm582_vm0, %v581_v0  ;;  %v274_v7 = vsel (!%p140_p9), %vm199_vm1, %v263_v6, 0  ;;  %s469_s11 = smul.u32 (!%p140_p9), 48, %s159_s10  ;;  %vm333_vm3 = vcmask (!%p140_p9), 392192  }
  0x10   : > { %456 = vmatpush3.bf16.msra.mxu1 (!%p140_p9), %v274_v7  ;;  %s470_s19 = smul.u32 (!%p140_p9), 768, %s627_s16 }
  0x11   : > { %s161_s17 = scalar_lea.vmem (!%p140_p9), [#allocation2], %s469_s11 }
  0x12   : > { %s354_s20 = sshll.u32 (!%p140_p9), %s161_s17, 4  ;;  %s694_s26 = scalar_lea.hbm (!%p140_p9), %s742_s3, %s470_s19  ;;  %s689_s20 = int_to_ptr.vmem [resolvable:$true] %s354_s20 }
  0x13   : > { %s517_s27 = scalar_lea.vmem (!%p140_p9), %s689_s20, 768 }
  0x14   : > { %p518_p11 = scmp.ne.s32.totalorder (!%p140_p9), %s689_s20, %s517_s27 }
  0x15   : > { %s163_s24 = scalar_select %p162_p10, %s627_s16, 1 }
  0x16   : > { %s698_s16 = scalar_lea.sflag [#allocation3], %s159_s10  ;;  %p519_p12 = pnand %p518_p11, %p644_p5 }
  0x17   : > { %s420_s25 = sshll.u32 %s163_s24, 2 }
  0x18   : > { %s165_s28 = scalar_lea.vmem %s739_s0, %s420_s25  ;;  %p520_p13 = pneg %p519_p12 }
  0x19   : > { %v173_v1 = vld [vmem:[%s165_s28] sm:$0xf]  ;;  %s583_s28 = smov [#allocation2]  }
  0x1a   : > { %v201_v2 = vsel %vm199_vm1, %v173_v1, 0  ;;  %s521_s29 = sshll.u32 %s583_s28, 4  ;;  %s522_s29 = int_to_ptr.vmem [resolvable:$false] %s521_s29 }
  0x1b   : > { %442 = vmatpush3.bf16.msra.mxu0 %v201_v2  ;;  %s523_s30 = scalar_lea.vmem %s522_s29, 1536  ;;  %p524_p0 = scmp.lt.s32.totalorder %s689_s20, %s522_s29 }
  0x1c   : > { %p525_p1 = scmp.lt.s32.totalorder %s523_s30, %s517_s27 }
  0x1e   : > { %444 = vmatmul.mubr.msk.bf16.vlgmr.msra.gmra.mrb[0].mxu0 %vm189_vm2, %v514_v3  ;;  %p526_p2 = por %p525_p1, %p524_p0 }
  0x1f   : > { %447 = vmatprep.mubr.msk.bf16.mxu0 %vm582_vm0, %v581_v0 }
  0x20   : > { %p527_p3 = pnand %p526_p2, %p520_p13 }
  0x26   : > { %448 = vmatmul.mubr.msk.bf16.gmra.mrb[4].mxu0 %vm189_vm2, %v515_v4 }
  0x27   : > { %451 = vmatprep.mubr.msk.bf16.mxu0 %vm582_vm0, %v581_v0 }
  0x2e   : > { %452 = vmatmul.mubr.msk.bf16.gmra.mrb[8].mxu0 %vm189_vm2, %v516_v5 }
  0xf1   : > { %v237_v8 = vpop.f32.mrb[0].mxu0 }
  0xf2   : > { %v445_v9 = vpop.f32.mrb[1].mxu0 }
  0xf3   : > { %v240_v10 = vpop.f32.mrb[2].mxu0 }
  0xf4   : > { %v260_v11 = vpack.c.bf16 %v240_v10, %v237_v8  ;;  %v446_v12 = vpop.f32.mrb[3].mxu0 }
  0xf6   : > { %458 = vmatmul.mubr.msk.bf16.vlgmr.msra.gmra.mrb[0].mxu1 %vm189_vm2, %v260_v11 }
  0xf7   : > { %461 = vmatprep.mubr.msk.bf16.mxu1 %vm582_vm0, %v581_v0 }
  0xf9   : > { %v245_v13 = vpop.f32.mrb[4].mxu0 }
  0xfa   : > { %v449_v14 = vpop.f32.mrb[5].mxu0 }
  0xfb   : > { %v248_v15 = vpop.f32.mrb[6].mxu0 }
  0xfc   : > { %v261_v16 = vpack.c.bf16 %v248_v15, %v245_v13  ;;  %v450_v17 = vpop.f32.mrb[7].mxu0 }
  0xfe   : > { %462 = vmatmul.mubr.msk.bf16.gmra.mrb[4].mxu1 %vm189_vm2, %v261_v16 }
  0xff   : > { %465 = vmatprep.mubr.msk.bf16.mxu1 %vm582_vm0, %v581_v0 }
 0x101   : > { %v253_v18 = vpop.f32.mrb[8].mxu0 }
 0x102   : > { %v453_v19 = vpop.f32.mrb[9].mxu0 }
 0x103   : > { %v256_v20 = vpop.f32.mrb[10].mxu0 }
 0x104   : > { %v262_v21 = vpack.c.bf16 %v256_v20, %v253_v18  ;;  %v454_v22 = vpop.f32.mrb[11].mxu0 }
 0x106   : > { %466 = vmatmul.mubr.msk.bf16.gmra.mrb[8].mxu1 %vm189_vm2, %v262_v21 }
 0x1c9   : > { %v310_v23 = vpop.f32.mrb[0].mxu1 }
 0x1ca   : > { %334 = vst.msk [vmem:[%s161_s17] sm:$0xff] %vm333_vm3, %v310_v23  ;;  %v459_v24 = vpop.f32.mrb[1].mxu1 }
 0x1cb   : > { %v313_v25 = vpop.f32.mrb[2].mxu1 }
 0x1cc   : > { %335 = vst.msk [vmem:[%s161_s17 + $0x8] sm:$0xff] %vm333_vm3, %v313_v25  ;;  %v460_v26 = vpop.f32.mrb[3].mxu1 }
 0x1d1   : > { %v318_v27 = vpop.f32.mrb[4].mxu1 }
 0x1d2   : > { %336 = vst.msk [vmem:[%s161_s17 + $0x10] sm:$0xff] %vm333_vm3, %v318_v27  ;;  %v463_v28 = vpop.f32.mrb[5].mxu1 }
 0x1d3   : > { %v321_v29 = vpop.f32.mrb[6].mxu1 }
 0x1d4   : > { %337 = vst.msk [vmem:[%s161_s17 + $0x18] sm:$0xff] %vm333_vm3, %v321_v29  ;;  %v464_v30 = vpop.f32.mrb[7].mxu1 }
 0x1d9   : > { %v326_v31 = vpop.f32.mrb[8].mxu1 }
 0x1da   : > { %338 = vst.msk [vmem:[%s161_s17 + $0x20] sm:$0xff] %vm333_vm3, %v326_v31  ;;  %v467_v32 = vpop.f32.mrb[9].mxu1 }
 0x1db   : > { %v329_v33 = vpop.f32.mrb[10].mxu1 }
 0x1dc   : > { %339 = vst.msk [vmem:[%s161_s17 + $0x28] sm:$0xff] %vm333_vm3, %v329_v33  ;;  %v468_v34 = vpop.f32.mrb[11].mxu1 }
 0x1dd   : > { %530 = shalt.err (!%p527_p3)
}
 0x1de   : > { %s531_s4 = scalar_lea.hbm %s694_s26, 768  ;;  %s535_s7 = scalar_lea.hbm %s742_s3, 1536 }
 0x1df   : > { %p532_p4 = scmp.ne.s32.totalorder %s694_s26, %s531_s4  ;;  %p536_p9 = scmp.lt.u32.totalorder %s694_s26, %s742_s3 }
 0x1e0   : > { %p537_p10 = scmp.lt.u32.totalorder %s535_s7, %s531_s4  ;;  %p539_p12 = scmp.lt.u32.totalorder %s531_s4, %s694_s26 }
 0x1e1   : > { %p533_p7 = pnand %p532_p4, %p644_p5 }
 0x1e2   : > { %p538_p11 = por %p537_p10, %p536_p9 }
 0x1e3   : > { %p534_p8 = pneg %p533_p7 }
 0x1e4   : > { %p540_p13 = por %p539_p12, %p538_p11 }
 0x1e6   : > { %p541_p0 = pnand %p540_p13, %p534_p8 }
 0x1e8   : > { %544 = shalt.err (!%p541_p0)
}
 0x1e9   : > { %s584_s10 = smov 128   ;;  %s585_s11 = smov 8  }
 0x1ea   : > { %471 = dma.vmem_to_hbm [thread:$0]  (%p644_p5), %s689_s20, 768, %s694_s26, %s698_s16, %s584_s10, %s584_s10, %s585_s11  }
 0x1eb PF: > { %p477_p1 = scmp.ge.s32.totalorder %s579_s15, 2  ;;  %s369_s17 = sand.u32 1, %s567_s12  }
 0x1ec   : > { %s370_s19 = scalar_lea.sflag [#allocation3], %s369_s17 }
 0x1ed   : > { %p474_p2 = pnand %p477_p1, %p648_p6 }
 0x1ef   : > { %562 = dma.done.wait (!%p474_p2), %s370_s19, 768  }
 0x1f0   : > { %564 = vsyncadd (!%p474_p2), %s370_s19, 4294966528  ;;  %p13_p3 = scmp.ge.s32.totalorder %s631_s18, 4   ;;  %s745_s12 = smov %s571_s13 }
 0x1f1   : > { %s746_s13 = smov %s575_s14  ;;  %s747_s14 = smov %s642_s21 }
 0x1f2   : > { %s748_s15 = smov %s631_s18  ;;  %15 = sbr.rel (!%p13_p3) target bundleno = 3 (0x3), region = 67 }
 0x1f9   :  { %375 = vsyncpa [#allocation3], 1 }
 0x1fa   :  { %377 = vsyncpa [#allocation3 + $0x1], 1 }

</bundles_post_ra>
